<compile_context>
chip_gen: v7x
topology: tpu7x:2x2x1
jax: 0.10.0
libtpu: 0.0.40
codegen_flags: <defaults>
</compile_context>

<pallas_src>
import functools

import jax
import jax.numpy as jnp
from jax import lax
from jax.experimental import pallas as pl
from jax.experimental.pallas import tpu as pltpu


def _round_up(x, m):
    return ((x + m - 1) // m) * m


def _bert_output_kernel(eps, mxu_dtype,
                        h_ref, res_ref, w_ref, b_ref, g_ref, beta_ref, o_ref):
    # Dense: (T, I) @ (I, H) on the MXU; bf16 operands, f32 accumulation.
    # The activation cast happens here (in-kernel) so the wrapper never does an
    # extra HBM pass over the M x I stream.
    x = jnp.dot(h_ref[...].astype(mxu_dtype), w_ref[...],
                preferred_element_type=jnp.float32)
    x = x + b_ref[...].astype(jnp.float32)            # bias (1, H) broadcasts
    # TODO(synk): training-mode dropout (hidden_dropout_prob) not implemented;
    # dropout is identity at inference time.
    x = x + res_ref[...].astype(jnp.float32)          # residual add
    # LayerNorm over the hidden (lane) axis: reductions -> XLU, rsqrt -> EUP,
    # both free slots while the MXU is the binding unit.
    mean = jnp.mean(x, axis=-1, keepdims=True)
    d = x - mean
    var = jnp.mean(d * d, axis=-1, keepdims=True)
    inv = lax.rsqrt(var + eps)
    y = d * (inv * g_ref[...].astype(jnp.float32)) + beta_ref[...].astype(jnp.float32)
    o_ref[...] = y.astype(o_ref.dtype)


def bert_output_forward(hidden_states, input_tensor, weight, bias, gamma, beta,
                        *, eps=1e-12, tile_rows=512, mxu_dtype=jnp.bfloat16,
                        out_dtype=None):
    """Fused dense + bias + residual + LayerNorm.

    hidden_states: (B, S, I), input_tensor: (B, S, H)
    weight: (I, H)  (already transposed vs. torch nn.Linear's (H, I))
    bias, gamma, beta: (H,)
    """
    B, S, I = hidden_states.shape
    H = input_tensor.shape[-1]
    M = B * S
    if out_dtype is None:
        out_dtype = hidden_states.dtype   # (bf16 output is an option on v6e if
                                          #  the downstream consumer tolerates it)

    # Native-dtype activation / residual streams (no wrapper cast / pad pass).
    h2 = hidden_states.reshape(M, I)
    r2 = input_tensor.reshape(M, H)
    # Parameters are tiny: cast the weight once to the MXU dtype (halves its
    # HBM read and VMEM footprint); per-feature params stay f32.
    w2 = weight.astype(mxu_dtype)
    b2 = bias.reshape(1, H).astype(jnp.float32)
    g2 = gamma.reshape(1, H).astype(jnp.float32)
    be2 = beta.reshape(1, H).astype(jnp.float32)

    act_isz = jnp.dtype(h2.dtype).itemsize
    res_isz = jnp.dtype(r2.dtype).itemsize
    out_isz = jnp.dtype(out_dtype).itemsize
    w_isz = jnp.dtype(mxu_dtype).itemsize

    # Worst-case VMEM working set (assume everything double-buffered so the
    # limit still holds if Buffered(1) on the params is unsupported).
    def block_bytes(tr):
        return (2 * tr * I * act_isz        # activation tile
                + 2 * tr * H * res_isz      # residual tile
                + 2 * tr * H * out_isz      # output tile
                + 2 * I * H * w_isz         # dense weight (constant index)
                + 8 * H * 4)                # bias / gamma / beta

    # Per-generation VMEM budget (v5e/v6e: 128 MiB, v7x: 64 MiB per TC).
    try:
        phys_vmem = int(pltpu.get_tpu_info().vmem_capacity_bytes)
    except Exception:
        phys_vmem = 64 * 1024 * 1024        # v7x-safe fallback
    budget = (phys_vmem * 7) // 8           # ~12.5% headroom for compiler scratch

    # Row tiling: multiples of 128 keep the MXU systolic array full; shrink the
    # tile until the worst-case working set fits the VMEM budget.
    tile_rows = max(128, _round_up(int(tile_rows), 128))
    tile_rows = min(tile_rows, _round_up(M, 128))
    while tile_rows > 128 and block_bytes(tile_rows) > budget:
        tile_rows = max(128, (tile_rows // 2) // 128 * 128)

    vmem_limit = int(min(budget, max(block_bytes(tile_rows) + (4 << 20), 32 << 20)))

    num_tiles = pl.cdiv(M, tile_rows)

    cost = pl.CostEstimate(
        flops=2 * M * I * H + 8 * M * H,
        transcendentals=M,                   # one rsqrt per row
        bytes_accessed=(h2.nbytes + r2.nbytes + w2.nbytes
                        + b2.nbytes + g2.nbytes + be2.nbytes
                        + M * H * out_isz),
    )

    def _run(single_buffer_params):
        def param_spec(shape):
            # Constant-index blocks: fetched once; request single-buffered VMEM
            # so the weight does not cost 2x its size (matters on 64 MiB v7x).
            if single_buffer_params:
                return pl.BlockSpec(shape, lambda i: (0, 0),
                                    pipeline_mode=pl.Buffered(1))
            return pl.BlockSpec(shape, lambda i: (0, 0))

        return pl.pallas_call(
            functools.partial(_bert_output_kernel, eps, mxu_dtype),
            out_shape=jax.ShapeDtypeStruct((M, H), out_dtype),
            grid_spec=pltpu.PrefetchScalarGridSpec(
                num_scalar_prefetch=0,
                grid=(num_tiles,),
                in_specs=[
                    pl.BlockSpec((tile_rows, I), lambda i: (i, 0)),  # activations
                    pl.BlockSpec((tile_rows, H), lambda i: (i, 0)),  # residual
                    param_spec((I, H)),                              # dense weight
                    param_spec((1, H)),                              # dense bias
                    param_spec((1, H)),                              # LN gamma
                    param_spec((1, H)),                              # LN beta
                ],
                out_specs=pl.BlockSpec((tile_rows, H), lambda i: (i, 0)),
            ),
            compiler_params=pltpu.CompilerParams(
                dimension_semantics=("parallel",),
                vmem_limit_bytes=vmem_limit,
            ),
            cost_estimate=cost,
        )(h2, r2, w2, b2, g2, be2)

    try:
        out = _run(True)
    except Exception:
        # TODO(synk): pipeline_mode=pl.Buffered(1) rejected by this JAX/Mosaic
        # build; fall back to default (double-buffered) constant-index params.
        out = _run(False)

    return out.reshape(B, S, H)


def _reference(hidden_states, input_tensor, weight, bias, gamma, beta, eps):
    x = jnp.einsum("bsi,ih->bsh", hidden_states, weight,
                   precision=lax.Precision.HIGHEST,
                   preferred_element_type=jnp.float32) + bias
    x = x + input_tensor
    mean = jnp.mean(x, axis=-1, keepdims=True)
    var = jnp.mean((x - mean) ** 2, axis=-1, keepdims=True)
    return (x - mean) * lax.rsqrt(var + eps) * gamma + beta


if __name__ == "__main__":
    eps = 1e-12
    hidden_size = 128
    intermediate_size = 512

    key = jax.random.PRNGKey(0)
    k1, k2, k3, k4 = jax.random.split(key, 4)

    # deterministic parameter init (synthetic; no checkpoint load)
    weight = jax.random.normal(k3, (intermediate_size, hidden_size), jnp.float32) * 0.02
    bias = jax.random.normal(k4, (hidden_size,), jnp.float32) * 0.02
    gamma = jnp.ones((hidden_size,), jnp.float32)
    beta = jnp.zeros((hidden_size,), jnp.float32)

    # Case 1: small BERT-like shapes; single ragged tile (M=24 < tile of 128).
    batch, seq = 2, 12
    hidden_states = jax.random.normal(k1, (batch, seq, intermediate_size), jnp.float32)
    input_tensor = jax.random.normal(k2, (batch, seq, hidden_size), jnp.float32)

    ref = _reference(hidden_states, input_tensor, weight, bias, gamma, beta, eps)
    out = bert_output_forward(hidden_states, input_tensor, weight, bias, gamma, beta,
                              eps=eps)
    out = jax.block_until_ready(out)
    assert out.shape == (batch, seq, hidden_size)
    assert jnp.allclose(out, ref, atol=2e-2, rtol=2e-2), \
        float(jnp.max(jnp.abs(out - ref)))

    # Case 2: multi-step grid with a ragged tail (M=144, tile=128 -> grid of 2,
    # last tile only 16 valid rows) to exercise masked out-of-bounds writes.
    batch2, seq2 = 2, 72
    k5, k6 = jax.random.split(k1)
    hidden_states2 = jax.random.normal(k5, (batch2, seq2, intermediate_size), jnp.float32)
    input_tensor2 = jax.random.normal(k6, (batch2, seq2, hidden_size), jnp.float32)

    ref2 = _reference(hidden_states2, input_tensor2, weight, bias, gamma, beta, eps)
    out2 = bert_output_forward(hidden_states2, input_tensor2, weight, bias, gamma, beta,
                               eps=eps, tile_rows=128)
    out2 = jax.block_until_ready(out2)
    assert out2.shape == (batch2, seq2, hidden_size)
    assert jnp.allclose(out2, ref2, atol=2e-2, rtol=2e-2), \
        float(jnp.max(jnp.abs(out2 - ref2)))

    print("KERNEL_OK")
</pallas_src>

<mosaic_0001>
module attributes {stable_mosaic.version = 11 : i64} {
  func.func @_bert_output_kernel(%arg0: i32, %arg1: memref<128x512xf32, #tpu.memory_space<vmem>>, %arg2: memref<128x128xf32, #tpu.memory_space<vmem>>, %arg3: memref<512x128xbf16, #tpu.memory_space<vmem>>, %arg4: memref<1x128xf32, #tpu.memory_space<vmem>>, %arg5: memref<1x128xf32, #tpu.memory_space<vmem>>, %arg6: memref<1x128xf32, #tpu.memory_space<vmem>>, %arg7: memref<128x128xf32, #tpu.memory_space<vmem>>) attributes {dimension_semantics = [#tpu.dimension_semantics<parallel>], iteration_bounds = array<i64: 1>, scalar_prefetch = 0 : i64, scratch_operands = 0 : i64, tpu.core_type = #tpu.core_type<tc>, window_params = [{transform_indices = @transform_0, window_bounds = array<i64: 128, 512>}, {transform_indices = @transform_1, window_bounds = array<i64: 128, 128>}, {pipeline_mode = #tpu.pipeline_mode<synchronous>, transform_indices = @transform_2, window_bounds = array<i64: 512, 128>}, {pipeline_mode = #tpu.pipeline_mode<synchronous>, transform_indices = @transform_3, window_bounds = array<i64: 1, 128>}, {pipeline_mode = #tpu.pipeline_mode<synchronous>, transform_indices = @transform_4, window_bounds = array<i64: 1, 128>}, {pipeline_mode = #tpu.pipeline_mode<synchronous>, transform_indices = @transform_5, window_bounds = array<i64: 1, 128>}, {transform_indices = @transform_6, window_bounds = array<i64: 128, 128>}]} {
    %c0 = arith.constant 0 : index
    %c0_0 = arith.constant 0 : index
    %0 = vector.load %arg1[%c0, %c0_0] : memref<128x512xf32, #tpu.memory_space<vmem>>, vector<128x512xf32>
    %1 = arith.truncf %0 : vector<128x512xf32> to vector<128x512xbf16>
    %c0_1 = arith.constant 0 : index
    %c0_2 = arith.constant 0 : index
    %2 = vector.load %arg3[%c0_1, %c0_2] : memref<512x128xbf16, #tpu.memory_space<vmem>>, vector<512x128xbf16>
    %cst = arith.constant dense<0.000000e+00> : vector<128x128xf32>
    %3 = tpu.matmul %1, %2, %cst {dimension_numbers = #tpu.dot_dimension_numbers<[1], [0], [0], [1], [0, 0, 1, 1], [], []>} : vector<128x512xbf16>, vector<512x128xbf16>, vector<128x128xf32> -> vector<128x128xf32>
    %c0_3 = arith.constant 0 : index
    %c0_4 = arith.constant 0 : index
    %4 = vector.load %arg4[%c0_3, %c0_4] : memref<1x128xf32, #tpu.memory_space<vmem>>, vector<1x128xf32>
    %5 = vector.broadcast %4 : vector<1x128xf32> to vector<128x128xf32>
    %6 = arith.addf %3, %5 : vector<128x128xf32>
    %c0_5 = arith.constant 0 : index
    %c0_6 = arith.constant 0 : index
    %7 = vector.load %arg2[%c0_5, %c0_6] : memref<128x128xf32, #tpu.memory_space<vmem>>, vector<128x128xf32>
    %8 = arith.addf %6, %7 : vector<128x128xf32>
    %cst_7 = arith.constant dense<0.000000e+00> : vector<128xf32>
    %9 = vector.multi_reduction <add>, %8, %cst_7 [1] : vector<128x128xf32> to vector<128xf32>
    %10 = vector.shape_cast %9 : vector<128xf32> to vector<128x1xf32>
    %cst_8 = arith.constant 1.280000e+02 : f32
    %11 = vector.broadcast %cst_8 : f32 to vector<128x1xf32>
    %12 = arith.divf %10, %11 : vector<128x1xf32>
    %13 = vector.broadcast %12 : vector<128x1xf32> to vector<128x128xf32>
    %14 = arith.subf %8, %13 : vector<128x128xf32>
    %15 = arith.mulf %14, %14 : vector<128x128xf32>
    %cst_9 = arith.constant dense<0.000000e+00> : vector<128xf32>
    %16 = vector.multi_reduction <add>, %15, %cst_9 [1] : vector<128x128xf32> to vector<128xf32>
    %17 = vector.shape_cast %16 : vector<128xf32> to vector<128x1xf32>
    %cst_10 = arith.constant 1.280000e+02 : f32
    %18 = vector.broadcast %cst_10 : f32 to vector<128x1xf32>
    %19 = arith.divf %17, %18 : vector<128x1xf32>
    %cst_11 = arith.constant 9.99999996E-13 : f32
    %20 = vector.broadcast %cst_11 : f32 to vector<128x1xf32>
    %21 = arith.addf %19, %20 : vector<128x1xf32>
    %22 = math.rsqrt %21 : vector<128x1xf32>
    %c0_12 = arith.constant 0 : index
    %c0_13 = arith.constant 0 : index
    %23 = vector.load %arg5[%c0_12, %c0_13] : memref<1x128xf32, #tpu.memory_space<vmem>>, vector<1x128xf32>
    %24 = vector.broadcast %22 : vector<128x1xf32> to vector<128x128xf32>
    %25 = vector.broadcast %23 : vector<1x128xf32> to vector<128x128xf32>
    %26 = arith.mulf %24, %25 : vector<128x128xf32>
    %27 = arith.mulf %14, %26 : vector<128x128xf32>
    %c0_14 = arith.constant 0 : index
    %c0_15 = arith.constant 0 : index
    %28 = vector.load %arg6[%c0_14, %c0_15] : memref<1x128xf32, #tpu.memory_space<vmem>>, vector<1x128xf32>
    %29 = vector.broadcast %28 : vector<1x128xf32> to vector<128x128xf32>
    %30 = arith.addf %27, %29 : vector<128x128xf32>
    %c0_16 = arith.constant 0 : index
    %c0_17 = arith.constant 0 : index
    %31 = vector.load %arg7[%c0_16, %c0_17] : memref<128x128xf32, #tpu.memory_space<vmem>>, vector<128x128xf32>
    tpu.vector_store %arg7[%c0_16, %c0_17], %30 {strides = array<i32>} : memref<128x128xf32, #tpu.memory_space<vmem>>, vector<128x128xf32>,
    return
  }
  func.func @transform_0(%arg0: i32) -> (i32, i32) {
    %c0_i32 = arith.constant 0 : i32
    %c0_i32_0 = arith.constant 0 : i32
    return %arg0, %c0_i32 : i32, i32
  }
  func.func @transform_1(%arg0: i32) -> (i32, i32) {
    %c0_i32 = arith.constant 0 : i32
    %c0_i32_0 = arith.constant 0 : i32
    return %arg0, %c0_i32 : i32, i32
  }
  func.func @transform_2(%arg0: i32) -> (i32, i32) {
    %c0_i32 = arith.constant 0 : i32
    %c0_i32_0 = arith.constant 0 : i32
    %c0_i32_1 = arith.constant 0 : i32
    return %c0_i32, %c0_i32_0 : i32, i32
  }
  func.func @transform_3(%arg0: i32) -> (i32, i32) {
    %c0_i32 = arith.constant 0 : i32
    %c0_i32_0 = arith.constant 0 : i32
    %c0_i32_1 = arith.constant 0 : i32
    return %c0_i32, %c0_i32_0 : i32, i32
  }
  func.func @transform_4(%arg0: i32) -> (i32, i32) {
    %c0_i32 = arith.constant 0 : i32
    %c0_i32_0 = arith.constant 0 : i32
    %c0_i32_1 = arith.constant 0 : i32
    return %c0_i32, %c0_i32_0 : i32, i32
  }
  func.func @transform_5(%arg0: i32) -> (i32, i32) {
    %c0_i32 = arith.constant 0 : i32
    %c0_i32_0 = arith.constant 0 : i32
    %c0_i32_1 = arith.constant 0 : i32
    return %c0_i32, %c0_i32_0 : i32, i32
  }
  func.func @transform_6(%arg0: i32) -> (i32, i32) {
    %c0_i32 = arith.constant 0 : i32
    %c0_i32_0 = arith.constant 0 : i32
    return %arg0, %c0_i32 : i32, i32
  }
}

module attributes {stable_mosaic.version = 11 : i64} {
  func.func @_bert_output_kernel(%arg0: i32, %arg1: memref<128x512xf32, #tpu.memory_space<vmem>>, %arg2: memref<128x128xf32, #tpu.memory_space<vmem>>, %arg3: memref<512x128xbf16, #tpu.memory_space<vmem>>, %arg4: memref<1x128xf32, #tpu.memory_space<vmem>>, %arg5: memref<1x128xf32, #tpu.memory_space<vmem>>, %arg6: memref<1x128xf32, #tpu.memory_space<vmem>>, %arg7: memref<128x128xf32, #tpu.memory_space<vmem>>) attributes {dimension_semantics = [#tpu.dimension_semantics<parallel>], iteration_bounds = array<i64: 1>, scalar_prefetch = 0 : i64, scratch_operands = 0 : i64, tpu.core_type = #tpu.core_type<tc>, window_params = [{transform_indices = @transform_0, window_bounds = array<i64: 128, 512>}, {transform_indices = @transform_1, window_bounds = array<i64: 128, 128>}, {pipeline_mode = #tpu.pipeline_mode<synchronous>, transform_indices = @transform_2, window_bounds = array<i64: 512, 128>}, {pipeline_mode = #tpu.pipeline_mode<synchronous>, transform_indices = @transform_3, window_bounds = array<i64: 1, 128>}, {pipeline_mode = #tpu.pipeline_mode<synchronous>, transform_indices = @transform_4, window_bounds = array<i64: 1, 128>}, {pipeline_mode = #tpu.pipeline_mode<synchronous>, transform_indices = @transform_5, window_bounds = array<i64: 1, 128>}, {transform_indices = @transform_6, window_bounds = array<i64: 128, 128>}]} {
    %c0 = arith.constant 0 : index
    %c0_0 = arith.constant 0 : index
    %0 = vector.load %arg1[%c0, %c0_0] : memref<128x512xf32, #tpu.memory_space<vmem>>, vector<128x512xf32>
    %1 = arith.truncf %0 : vector<128x512xf32> to vector<128x512xbf16>
    %c0_1 = arith.constant 0 : index
    %c0_2 = arith.constant 0 : index
    %2 = vector.load %arg3[%c0_1, %c0_2] : memref<512x128xbf16, #tpu.memory_space<vmem>>, vector<512x128xbf16>
    %cst = arith.constant dense<0.000000e+00> : vector<128x128xf32>
    %3 = tpu.matmul %1, %2, %cst {dimension_numbers = #tpu.dot_dimension_numbers<[1], [0], [0], [1], [0, 0, 1, 1], [], []>} : vector<128x512xbf16>, vector<512x128xbf16>, vector<128x128xf32> -> vector<128x128xf32>
    %c0_3 = arith.constant 0 : index
    %c0_4 = arith.constant 0 : index
    %4 = vector.load %arg4[%c0_3, %c0_4] : memref<1x128xf32, #tpu.memory_space<vmem>>, vector<1x128xf32>
    %5 = vector.broadcast %4 : vector<1x128xf32> to vector<128x128xf32>
    %6 = arith.addf %3, %5 : vector<128x128xf32>
    %c0_5 = arith.constant 0 : index
    %c0_6 = arith.constant 0 : index
    %7 = vector.load %arg2[%c0_5, %c0_6] : memref<128x128xf32, #tpu.memory_space<vmem>>, vector<128x128xf32>
    %8 = arith.addf %6, %7 : vector<128x128xf32>
    %cst_7 = arith.constant dense<0.000000e+00> : vector<128xf32>
    %9 = vector.multi_reduction <add>, %8, %cst_7 [1] : vector<128x128xf32> to vector<128xf32>
    %10 = vector.shape_cast %9 : vector<128xf32> to vector<128x1xf32>
    %cst_8 = arith.constant 1.280000e+02 : f32
    %11 = vector.broadcast %cst_8 : f32 to vector<128x1xf32>
    %12 = arith.divf %10, %11 : vector<128x1xf32>
    %13 = vector.broadcast %12 : vector<128x1xf32> to vector<128x128xf32>
    %14 = arith.subf %8, %13 : vector<128x128xf32>
    %15 = arith.mulf %14, %14 : vector<128x128xf32>
    %cst_9 = arith.constant dense<0.000000e+00> : vector<128xf32>
    %16 = vector.multi_reduction <add>, %15, %cst_9 [1] : vector<128x128xf32> to vector<128xf32>
    %17 = vector.shape_cast %16 : vector<128xf32> to vector<128x1xf32>
    %cst_10 = arith.constant 1.280000e+02 : f32
    %18 = vector.broadcast %cst_10 : f32 to vector<128x1xf32>
    %19 = arith.divf %17, %18 : vector<128x1xf32>
    %cst_11 = arith.constant 9.99999996E-13 : f32
    %20 = vector.broadcast %cst_11 : f32 to vector<128x1xf32>
    %21 = arith.addf %19, %20 : vector<128x1xf32>
    %22 = math.rsqrt %21 : vector<128x1xf32>
    %c0_12 = arith.constant 0 : index
    %c0_13 = arith.constant 0 : index
    %23 = vector.load %arg5[%c0_12, %c0_13] : memref<1x128xf32, #tpu.memory_space<vmem>>, vector<1x128xf32>
    %24 = vector.broadcast %22 : vector<128x1xf32> to vector<128x128xf32>
    %25 = vector.broadcast %23 : vector<1x128xf32> to vector<128x128xf32>
    %26 = arith.mulf %24, %25 : vector<128x128xf32>
    %27 = arith.mulf %14, %26 : vector<128x128xf32>
    %c0_14 = arith.constant 0 : index
    %c0_15 = arith.constant 0 : index
    %28 = vector.load %arg6[%c0_14, %c0_15] : memref<1x128xf32, #tpu.memory_space<vmem>>, vector<1x128xf32>
    %29 = vector.broadcast %28 : vector<1x128xf32> to vector<128x128xf32>
    %30 = arith.addf %27, %29 : vector<128x128xf32>
    %c0_16 = arith.constant 0 : index
    %c0_17 = arith.constant 0 : index
    %31 = vector.load %arg7[%c0_16, %c0_17] : memref<128x128xf32, #tpu.memory_space<vmem>>, vector<128x128xf32>
    tpu.vector_store %arg7[%c0_16, %c0_17], %30 {strides = array<i32>} : memref<128x128xf32, #tpu.memory_space<vmem>>, vector<128x128xf32>,
    return
  }
  func.func @transform_0(%arg0: i32) -> (i32, i32) {
    %c0_i32 = arith.constant 0 : i32
    %c0_i32_0 = arith.constant 0 : i32
    return %arg0, %c0_i32 : i32, i32
  }
  func.func @transform_1(%arg0: i32) -> (i32, i32) {
    %c0_i32 = arith.constant 0 : i32
    %c0_i32_0 = arith.constant 0 : i32
    return %arg0, %c0_i32 : i32, i32
  }
  func.func @transform_2(%arg0: i32) -> (i32, i32) {
    %c0_i32 = arith.constant 0 : i32
    %c0_i32_0 = arith.constant 0 : i32
    %c0_i32_1 = arith.constant 0 : i32
    return %c0_i32, %c0_i32_0 : i32, i32
  }
  func.func @transform_3(%arg0: i32) -> (i32, i32) {
    %c0_i32 = arith.constant 0 : i32
    %c0_i32_0 = arith.constant 0 : i32
    %c0_i32_1 = arith.constant 0 : i32
    return %c0_i32, %c0_i32_0 : i32, i32
  }
  func.func @transform_4(%arg0: i32) -> (i32, i32) {
    %c0_i32 = arith.constant 0 : i32
    %c0_i32_0 = arith.constant 0 : i32
    %c0_i32_1 = arith.constant 0 : i32
    return %c0_i32, %c0_i32_0 : i32, i32
  }
  func.func @transform_5(%arg0: i32) -> (i32, i32) {
    %c0_i32 = arith.constant 0 : i32
    %c0_i32_0 = arith.constant 0 : i32
    %c0_i32_1 = arith.constant 0 : i32
    return %c0_i32, %c0_i32_0 : i32, i32
  }
  func.func @transform_6(%arg0: i32) -> (i32, i32) {
    %c0_i32 = arith.constant 0 : i32
    %c0_i32_0 = arith.constant 0 : i32
    return %arg0, %c0_i32 : i32, i32
  }
}

</mosaic_0001>

<bundles_post_ra>
// kernel: tpu_custom_call.1
= control target key start
LH: loop header
LB: loop body
LE: loop exit
PB: predicated region body
PF: predicated region fallthrough
CT: control target
= control target key end

     0   :  { %11 = vsyncpa [#allocation3], 0  ;;  %s1545_s0 = inlined_call_operand.hbm [shape: f32[24,512], index: 0, kind: input, shape index: {}]   ;;  %s1546_s1 = inlined_call_operand.hbm [shape: f32[24,128], index: 1, kind: input, shape index: {}]   ;;  %s1547_s2 = inlined_call_operand.hbm [shape: bf16[512,128], index: 2, kind: input, shape index: {}]   ;;  %s1548_s3 = inlined_call_operand.vmem [shape: f32[1,128], index: 3, kind: input, shape index: {}]   ;;  %s1549_s4 = inlined_call_operand.vmem [shape: f32[1,128], index: 4, kind: input, shape index: {}]   ;;  %s1550_s5 = inlined_call_operand.vmem [shape: f32[1,128], index: 5, kind: input, shape index: {}]   ;;  %s1551_s6 = inlined_call_operand.hbm [shape: f32[24,128], index: 6, kind: output, shape index: {}]  }
   0x1   :  { %12 = vsyncpa [#allocation6], 0 }
   0x2   :  { %13 = vsyncpa [#allocation4], 0 }
   0x3   :  { %18 = vsyncadd [#allocation3], 6656  ;;  %s1239_s21 = smov [#allocation2]   ;;  %s1145_s25 = scalar_lea.hbm %s1545_s0, 1536 }
   0x4   :  { %s19_s22 = sshll.u32 %s1239_s21, 4  ;;  %p1146_p0 = scmp.ne.s32.totalorder %s1545_s0, %s1145_s25  ;;  %s20_s22 = int_to_ptr.vmem [resolvable:$true] %s19_s22 }
   0x5   :  { %p1149_p1 = scmp.lt.u32.totalorder %s1145_s25, %s1545_s0 }
   0x7   :  { %p1151_p2 = pnand %p1149_p1, %p1146_p0 }
   0x9   :  { %1154 = shalt.err (!%p1151_p2)
}
   0xa   :  { %s1155_s30 = scalar_lea.vmem %s20_s22, 1536  ;;  %s1159_s7 = scalar_lea.vmem %s20_s22, 8192 }
   0xb   :  { %p1156_p3 = scmp.ne.s32.totalorder %s20_s22, %s1155_s30  ;;  %p1160_p4 = scmp.lt.s32.totalorder %s20_s22, %s20_s22 }
   0xc   :  { %p1161_p5 = scmp.lt.s32.totalorder %s1159_s7, %s1155_s30 }
   0xe   :  { %p1162_p6 = por %p1161_p5, %p1160_p4 }
  0x10   :  { %p1163_p7 = pnand %p1162_p6, %p1156_p3 }
  0x12   :  { %1166 = shalt.err (!%p1163_p7)
}
  0x13   :  { %s1240_s8 = smov 512   ;;  %s1241_s9 = smov 32  }
  0x14   :  { %25 = dma.hbm_to_vmem [thread:$0]  %s1545_s0, 1536, %s20_s22, [#allocation3], %s1240_s8, %s1240_s8, %s1241_s9  }
  0x15   :  { %30 = vsyncadd [#allocation6], 1664  ;;  %s1242_s12 = smov [#allocation5]   ;;  %s1167_s16 = scalar_lea.hbm %s1546_s1, 384 }
  0x16   :  { %s31_s13 = sshll.u32 %s1242_s12, 4  ;;  %p1168_p8 = scmp.ne.s32.totalorder %s1546_s1, %s1167_s16  ;;  %s32_s13 = int_to_ptr.vmem [resolvable:$true] %s31_s13 }
  0x17   :  { %p1171_p9 = scmp.lt.u32.totalorder %s1167_s16, %s1546_s1 }
  0x19   :  { %p1173_p10 = pnand %p1171_p9, %p1168_p8 }
  0x1b   :  { %1176 = shalt.err (!%p1173_p10)
}
  0x1c   :  { %s1177_s21 = scalar_lea.vmem %s32_s13, 384  ;;  %s1181_s0 = scalar_lea.vmem %s32_s13, 2048 }
  0x1d   :  { %p1178_p11 = scmp.ne.s32.totalorder %s32_s13, %s1177_s21  ;;  %p1182_p12 = scmp.lt.s32.totalorder %s32_s13, %s32_s13 }
  0x1e   :  { %p1183_p13 = scmp.lt.s32.totalorder %s1181_s0, %s1177_s21 }
  0x20   :  { %p1184_p0 = por %p1183_p13, %p1182_p12 }
  0x22   :  { %p1185_p1 = pnand %p1184_p0, %p1178_p11 }
  0x24   :  { %1188 = shalt.err (!%p1185_p1)
}
  0x25   :  { %s1243_s22 = smov 128   ;;  %s1244_s23 = smov 8  }
  0x26   :  { %37 = dma.hbm_to_vmem [thread:$0]  %s1546_s1, 384, %s32_s13, [#allocation6], %s1243_s22, %s1243_s22, %s1244_s23  }
  0x27   :  { %s1245_s26 = smov [#allocation7]   ;;  %s1189_s30 = scalar_lea.hbm %s1547_s2, 4096 }
  0x28   :  { %s43_s27 = sshll.u32 %s1245_s26, 4  ;;  %p1190_p2 = scmp.ne.s32.totalorder %s1547_s2, %s1189_s30  ;;  %s44_s27 = int_to_ptr.vmem [resolvable:$true] %s43_s27 }
  0x29   :  { %p1193_p3 = scmp.lt.u32.totalorder %s1189_s30, %s1547_s2 }
  0x2b   :  { %p1195_p4 = pnand %p1193_p3, %p1190_p2 }
  0x2d   :  { %1198 = shalt.err (!%p1195_p4)
}
  0x2e   :  { %s1199_s11 = scalar_lea.vmem %s44_s27, 4096  ;;  %p1204_p6 = scmp.lt.s32.totalorder %s44_s27, %s44_s27 }
  0x2f   :  { %p1200_p5 = scmp.ne.s32.totalorder %s44_s27, %s1199_s11  ;;  %p1205_p7 = scmp.lt.s32.totalorder %s1199_s11, %s1199_s11 }
  0x31   :  { %p1206_p8 = por %p1205_p7, %p1204_p6 }
  0x33   :  { %p1207_p9 = pnand %p1206_p8, %p1200_p5 }
  0x35   :  { %1210 = shalt.err (!%p1207_p9)
}
  0x36   :  { %s1246_s1 = smov 64   ;;  %s1247_s12 = smov 4  }
  0x37   :  { %49 = dma.hbm_to_vmem [thread:$0]  %s1547_s2, 4096, %s44_s27, [#allocation6], %s1246_s1, %s1246_s1, %s1247_s12  }
  0x38   :  { %1233 = dma.done.wait [#allocation3], 8192  }
  0x39   :  { %1234 = vsyncadd [#allocation3], 4294959104 }
  0x3a   :  { %1235 = dma.done.wait [#allocation6], 6144  }
  0x3b   :  { %1236 = vsyncadd [#allocation6], 4294961152  ;;  %v1081_v0 = vld [vmem:[#allocation7 + $0x40] sm:$0xff]   ;;  %v1085_v4 = vld [vmem:[#allocation7 + $0x48] sm:$0xff]  }
  0x3c   :  { %v1082_v1 = vld [vmem:[#allocation7 + $0xc0] sm:$0xff]   ;;  %943 = vmatprep.subr.bf16.mxu0 %v1081_v0  ;;  %v1086_v5 = vld [vmem:[#allocation7 + $0xc8] sm:$0xff]   ;;  %v1089_v8 = vld [vmem:[#allocation7 + $0x50] sm:$0xff]  }
  0x3d   :  { %v1083_v2 = vld [vmem:[#allocation7] sm:$0xff]   ;;  %1007 = vmatprep.subr.bf16.mxu1 %v1082_v1  ;;  %v1087_v6 = vld [vmem:[#allocation7 + $0x8] sm:$0xff]   ;;  %v1090_v9 = vld [vmem:[#allocation7 + $0xd0] sm:$0xff]  }
  0x3e   :  { %v1084_v3 = vld [vmem:[#allocation7 + $0x80] sm:$0xff]   ;;  %944 = vmatpush3.bf16.msra.mxu0 %v1083_v2  ;;  %v1088_v7 = vld [vmem:[#allocation7 + $0x88] sm:$0xff]   ;;  %v1091_v10 = vld [vmem:[#allocation7 + $0x10] sm:$0xff]  }
  0x3f   :  { %1008 = vmatpush3.bf16.msra.mxu1 %v1084_v3  ;;  %945 = vmatprep.subr.bf16.mxu0 %v1085_v4  ;;  %v1092_v11 = vld [vmem:[#allocation7 + $0x90] sm:$0xff]   ;;  %v1093_v12 = vld [vmem:[#allocation7 + $0x58] sm:$0xff]   ;;  %v1097_v16 = vld [vmem:[#allocation7 + $0x60] sm:$0xff]  }
  0x40   :  { %1009 = vmatprep.subr.bf16.mxu1 %v1086_v5  ;;  %v1094_v13 = vld [vmem:[#allocation7 + $0xd8] sm:$0xff]   ;;  %v1098_v17 = vld [vmem:[#allocation7 + $0xe0] sm:$0xff]   ;;  %v1101_v20 = vld [vmem:[#allocation7 + $0x68] sm:$0xff]  }
  0x41   :  { %v1095_v14 = vld [vmem:[#allocation7 + $0x18] sm:$0xff]   ;;  %v1099_v18 = vld [vmem:[#allocation7 + $0x20] sm:$0xff]   ;;  %v1102_v21 = vld [vmem:[#allocation7 + $0xe8] sm:$0xff]  }
  0x42   :  { %946 = vmatpush3.bf16.msra.mxu0 %v1087_v6  ;;  %v1096_v15 = vld [vmem:[#allocation7 + $0x98] sm:$0xff]   ;;  %v1100_v19 = vld [vmem:[#allocation7 + $0xa0] sm:$0xff]   ;;  %v1103_v22 = vld [vmem:[#allocation7 + $0x28] sm:$0xff]  }
  0x43   :  { %1010 = vmatpush3.bf16.msra.mxu1 %v1088_v7  ;;  %947 = vmatprep.subr.bf16.mxu0 %v1089_v8  ;;  %v1104_v23 = vld [vmem:[#allocation7 + $0xa8] sm:$0xff]   ;;  %v1105_v24 = vld [vmem:[#allocation7 + $0x70] sm:$0xff]   ;;  %v1109_v28 = vld [vmem:[#allocation7 + $0x78] sm:$0xff]  }
  0x44   :  { %1011 = vmatprep.subr.bf16.mxu1 %v1090_v9  ;;  %v1106_v25 = vld [vmem:[#allocation7 + $0xf0] sm:$0xff]   ;;  %v1110_v29 = vld [vmem:[#allocation7 + $0xf8] sm:$0xff]   ;;  %v67_v32 = vld [vmem:[#allocation2 + $0x8] sm:$0xff] }
  0x45   :  { %v1107_v26 = vld [vmem:[#allocation7 + $0x30] sm:$0xff]   ;;  %v1111_v30 = vld [vmem:[#allocation7 + $0x38] sm:$0xff]   ;;  %v71_v33 = vld [vmem:[#allocation2 + $0x28] sm:$0xff] }
  0x46   :  { %948 = vmatpush3.bf16.msra.mxu0 %v1091_v10  ;;  %v1108_v27 = vld [vmem:[#allocation7 + $0xb0] sm:$0xff]   ;;  %v1112_v31 = vld [vmem:[#allocation7 + $0xb8] sm:$0xff]   ;;  %v131_v35 = vpack.c.bf16 %v71_v33, %v67_v32  ;;  %v66_v37 = vld [vmem:[#allocation2] sm:$0xff] }
  0x47   :  { %1012 = vmatpush3.bf16.msra.mxu1 %v1092_v11  ;;  %949 = vmatprep.subr.bf16.mxu0 %v1093_v12  ;;  %v69_v34 = vld [vmem:[#allocation2 + $0x18] sm:$0xff]  ;;  %v70_v38 = vld [vmem:[#allocation2 + $0x20] sm:$0xff]  ;;  %v68_v41 = vld [vmem:[#allocation2 + $0x10] sm:$0xff] }
  0x48   :  { %1013 = vmatprep.subr.bf16.mxu1 %v1094_v13  ;;  %v73_v36 = vld [vmem:[#allocation2 + $0x38] sm:$0xff]  ;;  %v130_v40 = vpack.c.bf16 %v70_v38, %v66_v37  ;;  %v72_v42 = vld [vmem:[#allocation2 + $0x30] sm:$0xff]  ;;  %v75_v43 = vld [vmem:[#allocation2 + $0x48] sm:$0xff]  ;;  %457 = vmatprep.mubr.bf16.mxu0 %v131_v35 }
  0x49   :  { %v133_v39 = vpack.c.bf16 %v73_v36, %v69_v34  ;;  %v132_v44 = vpack.c.bf16 %v72_v42, %v68_v41  ;;  %v79_v45 = vld [vmem:[#allocation2 + $0x68] sm:$0xff]  ;;  %v77_v46 = vld [vmem:[#allocation2 + $0x58] sm:$0xff]  ;;  %v74_v50 = vld [vmem:[#allocation2 + $0x40] sm:$0xff] }
  0x4a   :  { %950 = vmatpush3.bf16.msra.mxu0 %v1095_v14  ;;  %v81_v47 = vld [vmem:[#allocation2 + $0x78] sm:$0xff]  ;;  %v135_v48 = vpack.c.bf16 %v79_v45, %v75_v43  ;;  %v78_v51 = vld [vmem:[#allocation2 + $0x60] sm:$0xff]  ;;  %v76_v52 = vld [vmem:[#allocation2 + $0x50] sm:$0xff] }
  0x4b   :  { %1014 = vmatpush3.bf16.msra.mxu1 %v1096_v15  ;;  %951 = vmatprep.subr.bf16.mxu0 %v1097_v16  ;;  %v137_v49 = vpack.c.bf16 %v81_v47, %v77_v46  ;;  %v80_v53 = vld [vmem:[#allocation2 + $0x70] sm:$0xff]  ;;  %v83_v54 = vld [vmem:[#allocation2 + $0x88] sm:$0xff]  ;;  %v85_v56 = vld [vmem:[#allocation2 + $0x98] sm:$0xff]  ;;  %v134_v58 = vpack.c.bf16 %v78_v51, %v74_v50 }
  0x4c   :  { %1015 = vmatprep.subr.bf16.mxu1 %v1098_v17  ;;  %554 = vmatprep.mubr.bf16.mxu1 %v133_v39  ;;  %v87_v55 = vld [vmem:[#allocation2 + $0xa8] sm:$0xff]  ;;  %v89_v57 = vld [vmem:[#allocation2 + $0xb8] sm:$0xff]  ;;  %v136_v59 = vpack.c.bf16 %v80_v53, %v76_v52  ;;  %v82_v62 = vld [vmem:[#allocation2 + $0x80] sm:$0xff] }
  0x4d   :  { %v139_v60 = vpack.c.bf16 %v87_v55, %v83_v54  ;;  %v141_v61 = vpack.c.bf16 %v89_v57, %v85_v56  ;;  %v86_v63 = vld [vmem:[#allocation2 + $0xa0] sm:$0xff]  ;;  %v84_v0 = vld [vmem:[#allocation2 + $0x90] sm:$0xff]  ;;  %v91_v2 = vld [vmem:[#allocation2 + $0xc8] sm:$0xff] }
  0x4e   :  { %952 = vmatpush3.bf16.msra.mxu0 %v1099_v18  ;;  %v88_v1 = vld [vmem:[#allocation2 + $0xb0] sm:$0xff]  ;;  %v95_v3 = vld [vmem:[#allocation2 + $0xe8] sm:$0xff]  ;;  %v93_v4 = vld [vmem:[#allocation2 + $0xd8] sm:$0xff]  ;;  %v138_v6 = vpack.c.bf16 %v86_v63, %v82_v62 }
  0x4f   :  { %1016 = vmatpush3.bf16.msra.mxu1 %v1100_v19  ;;  %953 = vmatprep.subr.bf16.mxu0 %v1101_v20  ;;  %v97_v5 = vld [vmem:[#allocation2 + $0xf8] sm:$0xff]  ;;  %v140_v7 = vpack.c.bf16 %v88_v1, %v84_v0  ;;  %v143_v8 = vpack.c.bf16 %v95_v3, %v91_v2  ;;  %v90_v10 = vld [vmem:[#allocation2 + $0xc0] sm:$0xff]  ;;  %v92_v12 = vld [vmem:[#allocation2 + $0xd0] sm:$0xff] }
  0x50   :  { %1017 = vmatprep.subr.bf16.mxu1 %v1102_v21  ;;  %v145_v9 = vpack.c.bf16 %v97_v5, %v93_v4  ;;  %v94_v11 = vld [vmem:[#allocation2 + $0xe0] sm:$0xff]  ;;  %v96_v13 = vld [vmem:[#allocation2 + $0xf0] sm:$0xff]  ;;  %v99_v14 = vld [vmem:[#allocation2 + $0x108] sm:$0xff] }
  0x51   :  { %v103_v15 = vld [vmem:[#allocation2 + $0x128] sm:$0xff]  ;;  %v101_v16 = vld [vmem:[#allocation2 + $0x118] sm:$0xff]  ;;  %v142_v18 = vpack.c.bf16 %v94_v11, %v90_v10  ;;  %v144_v19 = vpack.c.bf16 %v96_v13, %v92_v12  ;;  %v106_v34 = vld [vmem:[#allocation2 + $0x140] sm:$0xff] }
  0x52   :  { %954 = vmatpush3.bf16.msra.mxu0 %v1103_v22  ;;  %v105_v17 = vld [vmem:[#allocation2 + $0x138] sm:$0xff]  ;;  %v147_v20 = vpack.c.bf16 %v103_v15, %v99_v14  ;;  %v98_v22 = vld [vmem:[#allocation2 + $0x100] sm:$0xff]  ;;  %v108_v36 = vld [vmem:[#allocation2 + $0x150] sm:$0xff] }
  0x53   :  { %1018 = vmatpush3.bf16.msra.mxu1 %v1104_v23  ;;  %955 = vmatprep.subr.bf16.mxu0 %v1105_v24  ;;  %v149_v21 = vpack.c.bf16 %v105_v17, %v101_v16  ;;  %v102_v23 = vld [vmem:[#allocation2 + $0x120] sm:$0xff]  ;;  %v100_v24 = vld [vmem:[#allocation2 + $0x110] sm:$0xff]  ;;  %v115_v38 = vld [vmem:[#allocation2 + $0x188] sm:$0xff] }
  0x54   :  { %1019 = vmatprep.subr.bf16.mxu1 %v1106_v25  ;;  %v104_v25 = vld [vmem:[#allocation2 + $0x130] sm:$0xff]  ;;  %v110_v35 = vld [vmem:[#allocation2 + $0x160] sm:$0xff]  ;;  %v119_v39 = vld [vmem:[#allocation2 + $0x1a8] sm:$0xff] }
  0x55   :  { %v112_v37 = vld [vmem:[#allocation2 + $0x170] sm:$0xff]  ;;  %v121_v41 = vld [vmem:[#allocation2 + $0x1b8] sm:$0xff]  ;;  %v150_v42 = vpack.c.bf16 %v110_v35, %v106_v34  ;;  %v114_v46 = vld [vmem:[#allocation2 + $0x180] sm:$0xff] }
  0x56   :  { %956 = vmatpush3.bf16.msra.mxu0 %v1107_v26  ;;  %v107_v26 = vld [vmem:[#allocation2 + $0x148] sm:$0xff]  ;;  %v152_v43 = vpack.c.bf16 %v112_v37, %v108_v36  ;;  %v118_v47 = vld [vmem:[#allocation2 + $0x1a0] sm:$0xff]  ;;  %v125_v52 = vld [vmem:[#allocation2 + $0x1d8] sm:$0xff] }
  0x57   :  { %1020 = vmatpush3.bf16.msra.mxu1 %v1108_v27  ;;  %957 = vmatprep.subr.bf16.mxu0 %v1109_v28  ;;  %v111_v27 = vld [vmem:[#allocation2 + $0x168] sm:$0xff]  ;;  %v109_v28 = vld [vmem:[#allocation2 + $0x158] sm:$0xff]  ;;  %v154_v54 = vpack.c.bf16 %v118_v47, %v114_v46  ;;  %v1326_v2 = vld [vmem:[%s1548_s3] ss:$0 sm:$0xff] }
  0x58   :  { %1021 = vmatprep.subr.bf16.mxu1 %v1110_v29  ;;  %v113_v29 = vld [vmem:[#allocation2 + $0x178] sm:$0xff]  ;;  %v151_v32 = vpack.c.bf16 %v111_v27, %v107_v26  ;;  %v123_v50 = vld [vmem:[#allocation2 + $0x1c8] sm:$0xff]  ;;  %v619_v14 = vld [vmem:[#allocation5] sm:$0xff] }
  0x59   :  { %v153_v33 = vpack.c.bf16 %v113_v29, %v109_v28  ;;  %v127_v51 = vld [vmem:[#allocation2 + $0x1e8] sm:$0xff]  ;;  %v129_v53 = vld [vmem:[#allocation2 + $0x1f8] sm:$0xff]  ;;  %v621_v34 = vld [vmem:[#allocation5 + $0x10] sm:$0xff] }
  0x5a   :  { %958 = vmatpush3.bf16.msra.mxu0 %v1111_v30  ;;  %v146_v30 = vpack.c.bf16 %v102_v23, %v98_v22  ;;  %v159_v56 = vpack.c.bf16 %v127_v51, %v123_v50  ;;  %v161_v57 = vpack.c.bf16 %v129_v53, %v125_v52  ;;  %v620_v22 = vld [vmem:[#allocation5 + $0x8] sm:$0xff] }
  0x5b   :  { %1022 = vmatpush3.bf16.msra.mxu1 %v1112_v31  ;;  %v148_v31 = vpack.c.bf16 %v104_v25, %v100_v24 }
  0x5d   :  { %458 = vmatmul.mubr.bf16.vlgmr.msra.gmra.mrb[0].mxu0 %v130_v40  ;;  %v117_v40 = vld [vmem:[#allocation2 + $0x198] sm:$0xff] }
  0x5e   :  { %555 = vmatmul.mubr.bf16.vlgmr.msra.gmra.mrb[0].mxu1 %v132_v44  ;;  %465 = vmatprep.mubr.bf16.mxu0 %v135_v48  ;;  %v155_v44 = vpack.c.bf16 %v119_v39, %v115_v38  ;;  %v157_v45 = vpack.c.bf16 %v121_v41, %v117_v40  ;;  %v116_v48 = vld [vmem:[#allocation2 + $0x190] sm:$0xff] }
  0x5f   :  { %562 = vmatprep.mubr.bf16.mxu1 %v137_v49  ;;  %v120_v49 = vld [vmem:[#allocation2 + $0x1b0] sm:$0xff] }
  0x60   :  { %v156_v55 = vpack.c.bf16 %v120_v49, %v116_v48 }
  0x65   :  { %466 = vmatmul.mubr.bf16.gmra.mrb[4].mxu0 %v134_v58  ;;  %v122_v58 = vld [vmem:[#allocation2 + $0x1c0] sm:$0xff] }
  0x66   :  { %563 = vmatmul.mubr.bf16.gmra.mrb[4].mxu1 %v136_v59  ;;  %473 = vmatprep.mubr.bf16.mxu0 %v139_v60  ;;  %v126_v59 = vld [vmem:[#allocation2 + $0x1e0] sm:$0xff]  ;;  %v124_v60 = vld [vmem:[#allocation2 + $0x1d0] sm:$0xff] }
  0x67   :  { %570 = vmatprep.mubr.bf16.mxu1 %v141_v61  ;;  %v128_v61 = vld [vmem:[#allocation2 + $0x1f0] sm:$0xff]  ;;  %v158_v62 = vpack.c.bf16 %v126_v59, %v122_v58 }
  0x68   :  { %v160_v63 = vpack.c.bf16 %v128_v61, %v124_v60 }
  0x6d   :  { %474 = vmatmul.mubr.bf16.gmra.mrb[8].mxu0 %v138_v6 }
  0x6e   :  { %571 = vmatmul.mubr.bf16.gmra.mrb[8].mxu1 %v140_v7  ;;  %481 = vmatprep.mubr.bf16.mxu0 %v143_v8 }
  0x6f   :  { %578 = vmatprep.mubr.bf16.mxu1 %v145_v9 }
  0x75   :  { %482 = vmatmul.mubr.bf16.gmra.mrb[12].mxu0 %v142_v18 }
  0x76   :  { %579 = vmatmul.mubr.bf16.gmra.mrb[12].mxu1 %v144_v19  ;;  %489 = vmatprep.mubr.bf16.mxu0 %v147_v20 }
  0x77   :  { %586 = vmatprep.mubr.bf16.mxu1 %v149_v21 }
  0x7d   :  { %490 = vmatmul.mubr.bf16.gmra.mrb[16].mxu0 %v146_v30 }
  0x7e   :  { %587 = vmatmul.mubr.bf16.gmra.mrb[16].mxu1 %v148_v31  ;;  %497 = vmatprep.mubr.bf16.mxu0 %v151_v32 }
  0x7f   :  { %594 = vmatprep.mubr.bf16.mxu1 %v153_v33 }
  0x85   :  { %498 = vmatmul.mubr.bf16.gmra.mrb[20].mxu0 %v150_v42  ;;  %v622_v42 = vld [vmem:[#allocation5 + $0x18] sm:$0xff] }
  0x86   :  { %595 = vmatmul.mubr.bf16.gmra.mrb[20].mxu1 %v152_v43  ;;  %505 = vmatprep.mubr.bf16.mxu0 %v155_v44 }
  0x87   :  { %602 = vmatprep.mubr.bf16.mxu1 %v157_v45 }
  0x8d   :  { %506 = vmatmul.mubr.bf16.gmra.mrb[24].mxu0 %v154_v54  ;;  %v623_v54 = vld [vmem:[#allocation5 + $0x20] sm:$0xff] }
  0x8e   :  { %603 = vmatmul.mubr.bf16.gmra.mrb[24].mxu1 %v156_v55  ;;  %513 = vmatprep.mubr.bf16.mxu0 %v159_v56 }
  0x8f   :  { %610 = vmatprep.mubr.bf16.mxu1 %v161_v57  ;;  %v624_v57 = vld [vmem:[#allocation5 + $0x28] sm:$0xff] }
  0x95   :  { %514 = vmatmul.mubr.bf16.gmra.mrb[28].mxu0 %v158_v62 }
  0x96   :  { %611 = vmatmul.mubr.bf16.gmra.mrb[28].mxu1 %v160_v63 }
 0x130   :  { %v959_v0 = vpop.f32.mrb[0].mxu0 }
 0x131   :  { %v1023_v1 = vpop.f32.mrb[0].mxu1  ;;  %v960_v3 = vpop.f32.mrb[1].mxu0 }
 0x132   :  { %v961_v4 = vadd.f32 %v960_v3, %v959_v0  ;;  %v1024_v5 = vpop.f32.mrb[1].mxu1  ;;  %v962_v6 = vpop.f32.mrb[2].mxu0 }
 0x133   :  { %v1025_v7 = vadd.f32 %v1024_v5, %v1023_v1  ;;  %v1026_v8 = vpop.f32.mrb[2].mxu1  ;;  %v963_v9 = vpop.f32.mrb[3].mxu0 }
 0x134   :  { %v460_v10 = vadd.f32 %v961_v4, %v1326_v2  ;;  %v964_v11 = vadd.f32 %v963_v9, %v962_v6  ;;  %v1027_v12 = vpop.f32.mrb[3].mxu1 }
 0x135   :  { %v1028_v13 = vadd.f32 %v1027_v12, %v1026_v8 }
 0x136   :  { %v557_v15 = vadd.f32 %v1025_v7, %v460_v10  ;;  %v463_v16 = vadd.f32 %v964_v11, %v1326_v2  ;;  %v625_v11 = vld [vmem:[#allocation5 + $0x30] sm:$0xff] }
 0x138   :  { %v560_v17 = vadd.f32 %v1028_v13, %v463_v16  ;;  %v965_v18 = vpop.f32.mrb[4].mxu0  ;;  %v1330_v19 = vadd.f32 %v619_v14, %v557_v15  ;;  %v626_v14 = vld [vmem:[#allocation5 + $0x38] sm:$0xff] }
 0x139   :  { %v1029_v20 = vpop.f32.mrb[4].mxu1  ;;  %v966_v21 = vpop.f32.mrb[5].mxu0 }
 0x13a   :  { %v967_v23 = vadd.f32 %v966_v21, %v965_v18  ;;  %v1030_v24 = vpop.f32.mrb[5].mxu1  ;;  %v968_v25 = vpop.f32.mrb[6].mxu0  ;;  %651 = vadd.xlane.f32.xlu0 %v1330_v19  ;;  %v1334_v32 = vadd.f32 %v620_v22, %v560_v17 }
 0x13b   :  { %v1031_v26 = vadd.f32 %v1030_v24, %v1029_v20  ;;  %v1032_v27 = vpop.f32.mrb[6].mxu1  ;;  %v969_v28 = vpop.f32.mrb[7].mxu0 }
 0x13c   :  { %v468_v29 = vadd.f32 %v967_v23, %v1326_v2  ;;  %v970_v30 = vadd.f32 %v969_v28, %v968_v25  ;;  %v1033_v31 = vpop.f32.mrb[7].mxu1 }
 0x13d   :  { %v1034_v33 = vadd.f32 %v1033_v31, %v1032_v27 }
 0x13e   :  { %v565_v35 = vadd.f32 %v1031_v26, %v468_v29  ;;  %v471_v36 = vadd.f32 %v970_v30, %v1326_v2  ;;  %653 = vadd.xlane.f32.xlu0 %v1334_v32 }
 0x140   :  { %v568_v37 = vadd.f32 %v1034_v33, %v471_v36  ;;  %v971_v38 = vpop.f32.mrb[8].mxu0  ;;  %v1338_v39 = vadd.f32 %v621_v34, %v565_v35  ;;  %v627_v33 = vld [vmem:[#allocation5 + $0x40] sm:$0xff]  ;;  %v628_v36 = vld [vmem:[#allocation5 + $0x48] sm:$0xff] }
 0x141   :  { %v1035_v40 = vpop.f32.mrb[8].mxu1  ;;  %v972_v41 = vpop.f32.mrb[9].mxu0 }
 0x142   :  { %v973_v43 = vadd.f32 %v972_v41, %v971_v38  ;;  %v1036_v44 = vpop.f32.mrb[9].mxu1  ;;  %v974_v45 = vpop.f32.mrb[10].mxu0  ;;  %655 = vadd.xlane.f32.xlu1 %v1338_v39  ;;  %v1342_v52 = vadd.f32 %v622_v42, %v568_v37 }
 0x143   :  { %v1037_v46 = vadd.f32 %v1036_v44, %v1035_v40  ;;  %v1038_v47 = vpop.f32.mrb[10].mxu1  ;;  %v975_v48 = vpop.f32.mrb[11].mxu0 }
 0x144   :  { %v476_v49 = vadd.f32 %v973_v43, %v1326_v2  ;;  %v976_v50 = vadd.f32 %v975_v48, %v974_v45  ;;  %v1039_v51 = vpop.f32.mrb[11].mxu1 }
 0x145   :  { %v1040_v53 = vadd.f32 %v1039_v51, %v1038_v47 }
 0x146   :  { %v573_v55 = vadd.f32 %v1037_v46, %v476_v49  ;;  %v479_v56 = vadd.f32 %v976_v50, %v1326_v2  ;;  %657 = vadd.xlane.f32.xlu1 %v1342_v52 }
 0x148   :  { %v576_v58 = vadd.f32 %v1040_v53, %v479_v56  ;;  %v977_v59 = vpop.f32.mrb[12].mxu0  ;;  %v1346_v60 = vadd.f32 %v623_v54, %v573_v55  ;;  %v629_v55 = vld [vmem:[#allocation5 + $0x50] sm:$0xff] }
 0x149   :  { %v1041_v61 = vpop.f32.mrb[12].mxu1  ;;  %v978_v62 = vpop.f32.mrb[13].mxu0 }
 0x14a   :  { %v979_v63 = vadd.f32 %v978_v62, %v977_v59  ;;  %v1042_v0 = vpop.f32.mrb[13].mxu1  ;;  %v980_v1 = vpop.f32.mrb[14].mxu0  ;;  %659 = vadd.xlane.f32.xlu0 %v1346_v60  ;;  %v1349_v3 = vadd.f32 %v624_v57, %v576_v58  ;;  %v630_v58 = vld [vmem:[#allocation5 + $0x58] sm:$0xff] }
 0x14b   :  { %v1043_v4 = vadd.f32 %v1042_v0, %v1041_v61  ;;  %v1044_v5 = vpop.f32.mrb[14].mxu1  ;;  %v981_v6 = vpop.f32.mrb[15].mxu0 }
 0x14c   :  { %v484_v7 = vadd.f32 %v979_v63, %v1326_v2  ;;  %v982_v8 = vadd.f32 %v981_v6, %v980_v1  ;;  %v1045_v9 = vpop.f32.mrb[15].mxu1  ;;  %661 = vadd.xlane.f32.xlu1 %v1349_v3 }
 0x14d   :  { %v1046_v10 = vadd.f32 %v1045_v9, %v1044_v5 }
 0x14e   :  { %v581_v12 = vadd.f32 %v1043_v4, %v484_v7  ;;  %v487_v13 = vadd.f32 %v982_v8, %v1326_v2 }
 0x150   :  { %v584_v15 = vadd.f32 %v1046_v10, %v487_v13  ;;  %v983_v16 = vpop.f32.mrb[16].mxu0  ;;  %v1354_v17 = vadd.f32 %v625_v11, %v581_v12 }
 0x151   :  { %v1047_v18 = vpop.f32.mrb[16].mxu1  ;;  %v984_v20 = vpop.f32.mrb[17].mxu0 }
 0x152   :  { %v985_v21 = vadd.f32 %v984_v20, %v983_v16  ;;  %v1048_v22 = vpop.f32.mrb[17].mxu1  ;;  %v986_v23 = vpop.f32.mrb[18].mxu0  ;;  %663 = vadd.xlane.f32.xlu0 %v1354_v17  ;;  %v1357_v24 = vadd.f32 %v626_v14, %v584_v15  ;;  %v631_v14 = vld [vmem:[#allocation5 + $0x60] sm:$0xff] }
 0x153   :  { %v1049_v25 = vadd.f32 %v1048_v22, %v1047_v18  ;;  %v1050_v26 = vpop.f32.mrb[18].mxu1  ;;  %v987_v27 = vpop.f32.mrb[19].mxu0  ;;  %v632_v18 = vld [vmem:[#allocation5 + $0x68] sm:$0xff] }
 0x154   :  { %v492_v28 = vadd.f32 %v985_v21, %v1326_v2  ;;  %v988_v29 = vadd.f32 %v987_v27, %v986_v23  ;;  %v1051_v30 = vpop.f32.mrb[19].mxu1  ;;  %665 = vadd.xlane.f32.xlu1 %v1357_v24 }
 0x155   :  { %v1052_v31 = vadd.f32 %v1051_v30, %v1050_v26 }
 0x156   :  { %v589_v34 = vadd.f32 %v1049_v25, %v492_v28  ;;  %v495_v35 = vadd.f32 %v988_v29, %v1326_v2 }
 0x158   :  { %v592_v37 = vadd.f32 %v1052_v31, %v495_v35  ;;  %v989_v38 = vpop.f32.mrb[20].mxu0  ;;  %v1362_v40 = vadd.f32 %v627_v33, %v589_v34 }
 0x159   :  { %v1053_v41 = vpop.f32.mrb[20].mxu1  ;;  %v990_v42 = vpop.f32.mrb[21].mxu0 }
 0x15a   :  { %v991_v43 = vadd.f32 %v990_v42, %v989_v38  ;;  %v1054_v44 = vpop.f32.mrb[21].mxu1  ;;  %v992_v45 = vpop.f32.mrb[22].mxu0  ;;  %667 = vadd.xlane.f32.xlu0 %v1362_v40  ;;  %v1365_v46 = vadd.f32 %v628_v36, %v592_v37  ;;  %v633_v38 = vld [vmem:[#allocation5 + $0x70] sm:$0xff] }
 0x15b   :  { %v1055_v47 = vadd.f32 %v1054_v44, %v1053_v41  ;;  %v1056_v48 = vpop.f32.mrb[22].mxu1  ;;  %v993_v49 = vpop.f32.mrb[23].mxu0 }
 0x15c   :  { %v500_v50 = vadd.f32 %v991_v43, %v1326_v2  ;;  %v994_v51 = vadd.f32 %v993_v49, %v992_v45  ;;  %v1057_v53 = vpop.f32.mrb[23].mxu1  ;;  %669 = vadd.xlane.f32.xlu1 %v1365_v46  ;;  %v634_v43 = vld [vmem:[#allocation5 + $0x78] sm:$0xff] }
 0x15d   :  { %v1058_v54 = vadd.f32 %v1057_v53, %v1056_v48 }
 0x15e   :  { %v597_v56 = vadd.f32 %v1055_v47, %v500_v50  ;;  %v503_v57 = vadd.f32 %v994_v51, %v1326_v2 }
 0x160   :  { %v600_v59 = vadd.f32 %v1058_v54, %v503_v57  ;;  %v995_v61 = vpop.f32.mrb[24].mxu0  ;;  %v1370_v62 = vadd.f32 %v629_v55, %v597_v56 }
 0x161   :  { %v1059_v63 = vpop.f32.mrb[24].mxu1  ;;  %v996_v0 = vpop.f32.mrb[25].mxu0 }
 0x162   :  { %v997_v1 = vadd.f32 %v996_v0, %v995_v61  ;;  %v1060_v4 = vpop.f32.mrb[25].mxu1  ;;  %v998_v5 = vpop.f32.mrb[26].mxu0  ;;  %671 = vadd.xlane.f32.xlu0 %v1370_v62  ;;  %v1373_v6 = vadd.f32 %v630_v58, %v600_v59 }
 0x163   :  { %v1061_v7 = vadd.f32 %v1060_v4, %v1059_v63  ;;  %v1062_v8 = vpop.f32.mrb[26].mxu1  ;;  %v999_v9 = vpop.f32.mrb[27].mxu0 }
 0x164   :  { %v508_v10 = vadd.f32 %v997_v1, %v1326_v2  ;;  %v1000_v11 = vadd.f32 %v999_v9, %v998_v5  ;;  %v1063_v12 = vpop.f32.mrb[27].mxu1  ;;  %673 = vadd.xlane.f32.xlu1 %v1373_v6 }
 0x165   :  { %v1064_v13 = vadd.f32 %v1063_v12, %v1062_v8 }
 0x166   :  { %v605_v15 = vadd.f32 %v1061_v7, %v508_v10  ;;  %v511_v16 = vadd.f32 %v1000_v11, %v1326_v2 }
 0x168   :  { %v608_v20 = vadd.f32 %v1064_v13, %v511_v16  ;;  %v1001_v21 = vpop.f32.mrb[28].mxu0  ;;  %v1378_v22 = vadd.f32 %v631_v14, %v605_v15 }
 0x169   :  { %v1065_v23 = vpop.f32.mrb[28].mxu1  ;;  %v1002_v25 = vpop.f32.mrb[29].mxu0 }
 0x16a   :  { %v1003_v26 = vadd.f32 %v1002_v25, %v1001_v21  ;;  %v1066_v27 = vpop.f32.mrb[29].mxu1  ;;  %v1004_v28 = vpop.f32.mrb[30].mxu0  ;;  %675 = vadd.xlane.f32.xlu0 %v1378_v22  ;;  %v1381_v29 = vadd.f32 %v632_v18, %v608_v20 }
 0x16b   :  { %v1067_v30 = vadd.f32 %v1066_v27, %v1065_v23  ;;  %v1068_v31 = vpop.f32.mrb[30].mxu1  ;;  %v1005_v33 = vpop.f32.mrb[31].mxu0 }
 0x16c   :  { %v516_v34 = vadd.f32 %v1003_v26, %v1326_v2  ;;  %v1006_v35 = vadd.f32 %v1005_v33, %v1004_v28  ;;  %v1069_v36 = vpop.f32.mrb[31].mxu1  ;;  %677 = vadd.xlane.f32.xlu1 %v1381_v29 }
 0x16d   :  { %v1070_v37 = vadd.f32 %v1069_v36, %v1068_v31 }
 0x16e   :  { %v613_v41 = vadd.f32 %v1067_v30, %v516_v34  ;;  %v519_v42 = vadd.f32 %v1006_v35, %v1326_v2 }
 0x170   :  { %v616_v44 = vadd.f32 %v1070_v37, %v519_v42  ;;  %v1386_v45 = vadd.f32 %v633_v38, %v613_v41 }
 0x172   :  { %679 = vadd.xlane.f32.xlu0 %v1386_v45  ;;  %v1389_v47 = vadd.f32 %v634_v43, %v616_v44 }
 0x174   :  { %681 = vadd.xlane.f32.xlu1 %v1389_v47 }
 0x1c7   :  { %v652_v48 = vpop.xlane.xlu0 %651 }
 0x1c8   :  { %v684_v49 = vmul.f32 0.0078125, %v652_v48 }
 0x1ca   :  { %v1393_v50 = vsub.f32 %v1330_v19, %v684_v49 }
 0x1cb   :  { %v654_v51 = vpop.xlane.xlu0 %653 }
 0x1cc   :  { %v685_v53 = vmul.f32 0.0078125, %v654_v51  ;;  %v716_v2 = vmul.f32 %v1393_v50, %v1393_v50 }
 0x1ce   :  { %v1398_v54 = vsub.f32 %v1334_v32, %v685_v53  ;;  %732 = vadd.xlane.f32.xlu0 %v716_v2 }
 0x1cf   :  { %v656_v55 = vpop.xlane.xlu1 %655 }
 0x1d0   :  { %v686_v56 = vmul.f32 0.0078125, %v656_v55  ;;  %v717_v57 = vmul.f32 %v1398_v54, %v1398_v54 }
 0x1d2   :  { %v1403_v58 = vsub.f32 %v1338_v39, %v686_v56  ;;  %734 = vadd.xlane.f32.xlu1 %v717_v57 }
 0x1d3   :  { %v658_v19 = vpop.xlane.xlu1 %657 }
 0x1d4   :  { %v687_v59 = vmul.f32 0.0078125, %v658_v19  ;;  %v718_v61 = vmul.f32 %v1403_v58, %v1403_v58 }
 0x1d6   :  { %v1408_v63 = vsub.f32 %v1342_v52, %v687_v59  ;;  %736 = vadd.xlane.f32.xlu0 %v718_v61  ;;  %v1475_v61 = vld [vmem:[%s1549_s4] ss:$0 sm:$0xff] }
 0x1d7   :  { %v660_v32 = vpop.xlane.xlu0 %659 }
 0x1d8   :  { %v688_v0 = vmul.f32 0.0078125, %v660_v32  ;;  %v719_v1 = vmul.f32 %v1408_v63, %v1408_v63 }
 0x1d9   :  { %v662_v4 = vpop.xlane.xlu1 %661 }
 0x1da   :  { %v1413_v5 = vsub.f32 %v1346_v60, %v688_v0  ;;  %v689_v39 = vmul.f32 0.0078125, %v662_v4  ;;  %738 = vadd.xlane.f32.xlu1 %v719_v1 }
 0x1dc   :  { %v1416_v7 = vsub.f32 %v1349_v3, %v689_v39  ;;  %v720_v8 = vmul.f32 %v1413_v5, %v1413_v5 }
 0x1de   :  { %740 = vadd.xlane.f32.xlu0 %v720_v8  ;;  %v721_v52 = vmul.f32 %v1416_v7, %v1416_v7  ;;  %v1481_v8 = vld [vmem:[%s1550_s5] ss:$0 sm:$0xff] }
 0x1df   :  { %v664_v9 = vpop.xlane.xlu0 %663 }
 0x1e0   :  { %v690_v10 = vmul.f32 0.0078125, %v664_v9  ;;  %742 = vadd.xlane.f32.xlu1 %v721_v52 }
 0x1e1   :  { %v666_v11 = vpop.xlane.xlu1 %665 }
 0x1e2   :  { %v1423_v12 = vsub.f32 %v1354_v17, %v690_v10  ;;  %v691_v60 = vmul.f32 0.0078125, %v666_v11 }
 0x1e4   :  { %v1426_v13 = vsub.f32 %v1357_v24, %v691_v60  ;;  %v722_v3 = vmul.f32 %v1423_v12, %v1423_v12 }
 0x1e6   :  { %744 = vadd.xlane.f32.xlu0 %v722_v3  ;;  %v723_v14 = vmul.f32 %v1426_v13, %v1426_v13 }
 0x1e7   :  { %v668_v15 = vpop.xlane.xlu0 %667 }
 0x1e8   :  { %v692_v16 = vmul.f32 0.0078125, %v668_v15  ;;  %746 = vadd.xlane.f32.xlu1 %v723_v14 }
 0x1e9   :  { %v670_v18 = vpop.xlane.xlu1 %669 }
 0x1ea   :  { %v1433_v20 = vsub.f32 %v1362_v40, %v692_v16  ;;  %v693_v17 = vmul.f32 0.0078125, %v670_v18 }
 0x1ec   :  { %v1436_v21 = vsub.f32 %v1365_v46, %v693_v17  ;;  %v724_v24 = vmul.f32 %v1433_v20, %v1433_v20 }
 0x1ee   :  { %748 = vadd.xlane.f32.xlu0 %v724_v24  ;;  %v725_v23 = vmul.f32 %v1436_v21, %v1436_v21 }
 0x1ef   :  { %v672_v25 = vpop.xlane.xlu0 %671 }
 0x1f0   :  { %v694_v26 = vmul.f32 0.0078125, %v672_v25  ;;  %750 = vadd.xlane.f32.xlu1 %v725_v23 }
 0x1f1   :  { %v674_v27 = vpop.xlane.xlu1 %673 }
 0x1f2   :  { %v1443_v28 = vsub.f32 %v1370_v62, %v694_v26  ;;  %v695_v40 = vmul.f32 0.0078125, %v674_v27 }
 0x1f4   :  { %v1446_v30 = vsub.f32 %v1373_v6, %v695_v40  ;;  %v726_v46 = vmul.f32 %v1443_v28, %v1443_v28 }
 0x1f6   :  { %752 = vadd.xlane.f32.xlu0 %v726_v46  ;;  %v727_v31 = vmul.f32 %v1446_v30, %v1446_v30 }
 0x1f7   :  { %v676_v33 = vpop.xlane.xlu0 %675 }
 0x1f8   :  { %v696_v34 = vmul.f32 0.0078125, %v676_v33  ;;  %754 = vadd.xlane.f32.xlu1 %v727_v31 }
 0x1f9   :  { %v678_v35 = vpop.xlane.xlu1 %677 }
 0x1fa   :  { %v1453_v36 = vsub.f32 %v1378_v22, %v696_v34  ;;  %v697_v62 = vmul.f32 0.0078125, %v678_v35 }
 0x1fc   :  { %v1456_v37 = vsub.f32 %v1381_v29, %v697_v62  ;;  %v728_v6 = vmul.f32 %v1453_v36, %v1453_v36 }
 0x1fe   :  { %756 = vadd.xlane.f32.xlu0 %v728_v6  ;;  %v729_v38 = vmul.f32 %v1456_v37, %v1456_v37 }
 0x1ff   :  { %v680_v41 = vpop.xlane.xlu0 %679 }
 0x200   :  { %v698_v42 = vmul.f32 0.0078125, %v680_v41  ;;  %758 = vadd.xlane.f32.xlu1 %v729_v38 }
 0x201   :  { %v682_v43 = vpop.xlane.xlu1 %681 }
 0x202   :  { %v1463_v44 = vsub.f32 %v1386_v45, %v698_v42  ;;  %v699_v22 = vmul.f32 0.0078125, %v682_v43 }
 0x204   :  { %v1466_v48 = vsub.f32 %v1389_v47, %v699_v22  ;;  %v730_v29 = vmul.f32 %v1463_v44, %v1463_v44 }
 0x206   :  { %760 = vadd.xlane.f32.xlu0 %v730_v29  ;;  %v731_v49 = vmul.f32 %v1466_v48, %v1466_v48 }
 0x208   :  { %762 = vadd.xlane.f32.xlu1 %v731_v49 }
 0x25b   :  { %v733_v51 = vpop.xlane.xlu0 %732 }
 0x25c   :  { %v764_v53 = vmul.f32 0.0078125, %v733_v51 }
 0x25e   :  { %v780_v2 = vadd.f32 1e-12, %v764_v53 }
 0x25f   :  { %v735_v55 = vpop.xlane.xlu1 %734 }
 0x260   :  { %1113 = vrsqrt.f32 %v780_v2  ;;  %v765_v56 = vmul.f32 0.0078125, %v735_v55 }
 0x262   :  { %v781_v45 = vadd.f32 1e-12, %v765_v56 }
 0x263   :  { %v737_v57 = vpop.xlane.xlu0 %736 }
 0x264   :  { %1115 = vrsqrt.f32 %v781_v45  ;;  %v766_v19 = vmul.f32 0.0078125, %v737_v57 }
 0x266   :  { %v782_v47 = vadd.f32 1e-12, %v766_v19 }
 0x267   :  { %v739_v59 = vpop.xlane.xlu1 %738 }
 0x268   :  { %1117 = vrsqrt.f32 %v782_v47  ;;  %v767_v32 = vmul.f32 0.0078125, %v739_v59 }
 0x26a   :  { %v1114_v0 = vpop.eup %1113  ;;  %v783_v1 = vadd.f32 1e-12, %v767_v32 }
 0x26b   :  { %v819_v4 = vmul.f32 %v1114_v0, %v1475_v61  ;;  %v741_v39 = vpop.xlane.xlu0 %740 }
 0x26c   :  { %1119 = vrsqrt.f32 %v783_v1  ;;  %v768_v52 = vmul.f32 0.0078125, %v741_v39 }
 0x26d   :  { %v835_v9 = vmul.f32 %v819_v4, %v1393_v50  ;;  %v743_v10 = vpop.xlane.xlu1 %742 }
 0x26e   :  { %v1116_v11 = vpop.eup %1115  ;;  %v784_v60 = vadd.f32 1e-12, %v768_v52  ;;  %v769_v3 = vmul.f32 0.0078125, %v743_v10 }
 0x26f   :  { %v858_v14 = vadd.f32 %v1481_v8, %v835_v9  ;;  %v820_v15 = vmul.f32 %v1116_v11, %v1475_v61 }
 0x270   :  { %1121 = vrsqrt.f32 %v784_v60  ;;  %v785_v16 = vadd.f32 1e-12, %v769_v3 }
 0x271   :  { %874 = vst [vmem:[#allocation8] sm:$0xff] %v858_v14  ;;  %v836_v18 = vmul.f32 %v820_v15, %v1398_v54 }
 0x272   :  { %v1118_v17 = vpop.eup %1117  ;;  %1123 = vrsqrt.f32 %v785_v16 }
 0x273   :  { %v859_v24 = vadd.f32 %v1481_v8, %v836_v18  ;;  %v821_v23 = vmul.f32 %v1118_v17, %v1475_v61  ;;  %v745_v50 = vpop.xlane.xlu0 %744 }
 0x274   :  { %v770_v25 = vmul.f32 0.0078125, %v745_v50 }
 0x275   :  { %875 = vst [vmem:[#allocation8 + $0x8] sm:$0xff] %v859_v24  ;;  %v837_v26 = vmul.f32 %v821_v23, %v1403_v58  ;;  %v747_v27 = vpop.xlane.xlu1 %746 }
 0x276   :  { %v1120_v40 = vpop.eup %1119  ;;  %v786_v46 = vadd.f32 1e-12, %v770_v25  ;;  %v771_v31 = vmul.f32 0.0078125, %v747_v27 }
 0x277   :  { %v860_v33 = vadd.f32 %v1481_v8, %v837_v26  ;;  %v822_v34 = vmul.f32 %v1120_v40, %v1475_v61 }
 0x278   :  { %1125 = vrsqrt.f32 %v786_v46  ;;  %v787_v54 = vadd.f32 1e-12, %v771_v31 }
 0x279   :  { %876 = vst [vmem:[#allocation8 + $0x10] sm:$0xff] %v860_v33  ;;  %v838_v35 = vmul.f32 %v822_v34, %v1408_v63 }
 0x27a   :  { %v1122_v62 = vpop.eup %1121  ;;  %1127 = vrsqrt.f32 %v787_v54 }
 0x27b   :  { %v861_v6 = vadd.f32 %v1481_v8, %v838_v35  ;;  %v823_v38 = vmul.f32 %v1122_v62, %v1475_v61  ;;  %v749_v58 = vpop.xlane.xlu0 %748 }
 0x27c   :  { %v1124_v41 = vpop.eup %1123  ;;  %v772_v42 = vmul.f32 0.0078125, %v749_v58 }
 0x27d   :  { %877 = vst [vmem:[#allocation8 + $0x18] sm:$0xff] %v861_v6  ;;  %v839_v43 = vmul.f32 %v823_v38, %v1413_v5  ;;  %v824_v22 = vmul.f32 %v1124_v41, %v1475_v61  ;;  %v751_v29 = vpop.xlane.xlu1 %750 }
 0x27e   :  { %v788_v49 = vadd.f32 1e-12, %v772_v42  ;;  %v773_v51 = vmul.f32 0.0078125, %v751_v29 }
 0x27f   :  { %v862_v53 = vadd.f32 %v1481_v8, %v839_v43  ;;  %v840_v63 = vmul.f32 %v824_v22, %v1416_v7 }
 0x280   :  { %1129 = vrsqrt.f32 %v788_v49  ;;  %v789_v2 = vadd.f32 1e-12, %v773_v51 }
 0x281   :  { %878 = vst [vmem:[#allocation8 + $0x20] sm:$0xff] %v862_v53  ;;  %v863_v55 = vadd.f32 %v1481_v8, %v840_v63 }
 0x282   :  { %v1126_v56 = vpop.eup %1125  ;;  %1131 = vrsqrt.f32 %v789_v2 }
 0x283   :  { %879 = vst [vmem:[#allocation8 + $0x28] sm:$0xff] %v863_v55  ;;  %v825_v45 = vmul.f32 %v1126_v56, %v1475_v61  ;;  %v753_v5 = vpop.xlane.xlu0 %752 }
 0x284   :  { %v1128_v57 = vpop.eup %1127  ;;  %v774_v19 = vmul.f32 0.0078125, %v753_v5 }
 0x285   :  { %v841_v47 = vmul.f32 %v825_v45, %v1423_v12  ;;  %v826_v59 = vmul.f32 %v1128_v57, %v1475_v61  ;;  %v755_v32 = vpop.xlane.xlu1 %754 }
 0x286   :  { %v790_v0 = vadd.f32 1e-12, %v774_v19  ;;  %v775_v7 = vmul.f32 0.0078125, %v755_v32 }
 0x287   :  { %v864_v1 = vadd.f32 %v1481_v8, %v841_v47  ;;  %v842_v4 = vmul.f32 %v826_v59, %v1426_v13 }
 0x288   :  { %1133 = vrsqrt.f32 %v790_v0  ;;  %v791_v39 = vadd.f32 1e-12, %v775_v7 }
 0x289   :  { %880 = vst [vmem:[#allocation8 + $0x30] sm:$0xff] %v864_v1  ;;  %v865_v52 = vadd.f32 %v1481_v8, %v842_v4 }
 0x28a   :  { %v1130_v9 = vpop.eup %1129  ;;  %1135 = vrsqrt.f32 %v791_v39 }
 0x28b   :  { %881 = vst [vmem:[#allocation8 + $0x38] sm:$0xff] %v865_v52  ;;  %v827_v10 = vmul.f32 %v1130_v9, %v1475_v61  ;;  %v757_v12 = vpop.xlane.xlu0 %756 }
 0x28c   :  { %v1132_v11 = vpop.eup %1131  ;;  %v776_v60 = vmul.f32 0.0078125, %v757_v12 }
 0x28d   :  { %v843_v3 = vmul.f32 %v827_v10, %v1433_v20  ;;  %v828_v14 = vmul.f32 %v1132_v11, %v1475_v61  ;;  %v759_v15 = vpop.xlane.xlu1 %758 }
 0x28e   :  { %v792_v16 = vadd.f32 1e-12, %v776_v60  ;;  %v777_v13 = vmul.f32 0.0078125, %v759_v15 }
 0x28f   :  { %v866_v18 = vadd.f32 %v1481_v8, %v843_v3  ;;  %v844_v17 = vmul.f32 %v828_v14, %v1436_v21 }
 0x290   :  { %1137 = vrsqrt.f32 %v792_v16  ;;  %v793_v24 = vadd.f32 1e-12, %v777_v13 }
 0x291   :  { %882 = vst [vmem:[#allocation8 + $0x40] sm:$0xff] %v866_v18  ;;  %v867_v23 = vadd.f32 %v1481_v8, %v844_v17 }
 0x292   :  { %v1134_v50 = vpop.eup %1133  ;;  %1139 = vrsqrt.f32 %v793_v24 }
 0x293   :  { %883 = vst [vmem:[#allocation8 + $0x48] sm:$0xff] %v867_v23  ;;  %v829_v25 = vmul.f32 %v1134_v50, %v1475_v61  ;;  %v761_v20 = vpop.xlane.xlu0 %760 }
 0x294   :  { %v1136_v26 = vpop.eup %1135  ;;  %v778_v27 = vmul.f32 0.0078125, %v761_v20 }
 0x295   :  { %v845_v40 = vmul.f32 %v829_v25, %v1443_v28  ;;  %v830_v46 = vmul.f32 %v1136_v26, %v1475_v61  ;;  %v763_v31 = vpop.xlane.xlu1 %762 }
 0x296   :  { %v794_v33 = vadd.f32 1e-12, %v778_v27  ;;  %v779_v21 = vmul.f32 0.0078125, %v763_v31 }
 0x297   :  { %v868_v34 = vadd.f32 %v1481_v8, %v845_v40  ;;  %v846_v54 = vmul.f32 %v830_v46, %v1446_v30 }
 0x298   :  { %1141 = vrsqrt.f32 %v794_v33  ;;  %v795_v35 = vadd.f32 1e-12, %v779_v21 }
 0x299   :  { %884 = vst [vmem:[#allocation8 + $0x50] sm:$0xff] %v868_v34  ;;  %v869_v62 = vadd.f32 %v1481_v8, %v846_v54 }
 0x29a   :  { %v1138_v6 = vpop.eup %1137  ;;  %1143 = vrsqrt.f32 %v795_v35 }
 0x29b   :  { %885 = vst [vmem:[#allocation8 + $0x58] sm:$0xff] %v869_v62  ;;  %v831_v38 = vmul.f32 %v1138_v6, %v1475_v61 }
 0x29c   :  { %v1140_v28 = vpop.eup %1139 }
 0x29d   :  { %v847_v58 = vmul.f32 %v831_v38, %v1453_v36  ;;  %v832_v41 = vmul.f32 %v1140_v28, %v1475_v61 }
 0x29f   :  { %v870_v42 = vadd.f32 %v1481_v8, %v847_v58  ;;  %v848_v43 = vmul.f32 %v832_v41, %v1456_v37 }
 0x2a1   :  { %886 = vst [vmem:[#allocation8 + $0x60] sm:$0xff] %v870_v42  ;;  %v871_v30 = vadd.f32 %v1481_v8, %v848_v43 }
 0x2a2   :  { %v1142_v22 = vpop.eup %1141 }
 0x2a3   :  { %887 = vst [vmem:[#allocation8 + $0x68] sm:$0xff] %v871_v30  ;;  %v833_v29 = vmul.f32 %v1142_v22, %v1475_v61 }
 0x2a4   :  { %v1144_v49 = vpop.eup %1143 }
 0x2a5   :  { %v849_v51 = vmul.f32 %v833_v29, %v1463_v44  ;;  %v834_v53 = vmul.f32 %v1144_v49, %v1475_v61 }
 0x2a7   :  { %v872_v36 = vadd.f32 %v1481_v8, %v849_v51  ;;  %v850_v63 = vmul.f32 %v834_v53, %v1466_v48 }
 0x2a9   :  { %888 = vst [vmem:[#allocation8 + $0x70] sm:$0xff] %v872_v36  ;;  %v873_v2 = vadd.f32 %v1481_v8, %v850_v63 }
 0x2ab   :  { %889 = vst [vmem:[#allocation8 + $0x78] sm:$0xff] %v873_v2 }
 0x2ac   :  { %894 = vsyncadd [#allocation4], 1664  ;;  %s1248_s4 = smov [#allocation8]  }
 0x2ad   :  { %s895_s5 = sshll.u32 %s1248_s4, 4  ;;  %s896_s5 = int_to_ptr.vmem [resolvable:$true] %s895_s5 }
 0x2ae   :  { %s1211_s19 = scalar_lea.vmem %s896_s5, 384  ;;  %s1215_s20 = scalar_lea.vmem %s896_s5, 2048 }
 0x2af   :  { %p1212_p10 = scmp.ne.s32.totalorder %s896_s5, %s1211_s19  ;;  %p1216_p11 = scmp.lt.s32.totalorder %s896_s5, %s896_s5 }
 0x2b0   :  { %p1217_p12 = scmp.lt.s32.totalorder %s1215_s20, %s1211_s19 }
 0x2b2   :  { %p1218_p13 = por %p1217_p12, %p1216_p11 }
 0x2b4   :  { %p1219_p0 = pnand %p1218_p13, %p1212_p10 }
 0x2b6   :  { %1222 = shalt.err (!%p1219_p0)
}
 0x2b7   :  { %s1223_s24 = scalar_lea.hbm %s1551_s6, 384 }
 0x2b8   :  { %p1224_p1 = scmp.ne.s32.totalorder %s1551_s6, %s1223_s24  ;;  %p1227_p2 = scmp.lt.u32.totalorder %s1223_s24, %s1551_s6 }
 0x2ba   :  { %p1229_p3 = pnand %p1227_p2, %p1224_p1 }
 0x2bc   :  { %1232 = shalt.err (!%p1229_p3)
}
 0x2bd   :  { %901 = dma.vmem_to_hbm [thread:$0]  %s896_s5, 384, %s1551_s6, [#allocation4], %s1243_s22, %s1243_s22, %s1244_s23  }
 0x2be   :  { %1237 = dma.done.wait [#allocation4], 2048  }
 0x2bf   :  { %1238 = vsyncadd [#allocation4], 4294965248 }
 0x2c0   :  { %905 = vsyncpa [#allocation3], 1 }
 0x2c1   :  { %906 = vsyncpa [#allocation6], 1 }
 0x2c2   :  { %907 = vsyncpa [#allocation4], 1 }

// kernel: tpu_custom_call.1
= control target key start
LH: loop header
LB: loop body
LE: loop exit
PB: predicated region body
PF: predicated region fallthrough
CT: control target
= control target key end

     0   :  { %11 = vsyncpa [#allocation3], 0  ;;  %s1545_s0 = inlined_call_operand.hbm [shape: f32[24,512], index: 0, kind: input, shape index: {}]   ;;  %s1546_s1 = inlined_call_operand.hbm [shape: f32[24,128], index: 1, kind: input, shape index: {}]   ;;  %s1547_s2 = inlined_call_operand.hbm [shape: bf16[512,128], index: 2, kind: input, shape index: {}]   ;;  %s1548_s3 = inlined_call_operand.vmem [shape: f32[1,128], index: 3, kind: input, shape index: {}]   ;;  %s1549_s4 = inlined_call_operand.vmem [shape: f32[1,128], index: 4, kind: input, shape index: {}]   ;;  %s1550_s5 = inlined_call_operand.vmem [shape: f32[1,128], index: 5, kind: input, shape index: {}]   ;;  %s1551_s6 = inlined_call_operand.hbm [shape: f32[24,128], index: 6, kind: output, shape index: {}]  }
   0x1   :  { %12 = vsyncpa [#allocation6], 0 }
   0x2   :  { %13 = vsyncpa [#allocation4], 0 }
   0x3   :  { %18 = vsyncadd [#allocation3], 6656  ;;  %s1239_s21 = smov [#allocation2]   ;;  %s1145_s25 = scalar_lea.hbm %s1545_s0, 1536 }
   0x4   :  { %s19_s22 = sshll.u32 %s1239_s21, 4  ;;  %p1146_p0 = scmp.ne.s32.totalorder %s1545_s0, %s1145_s25  ;;  %s20_s22 = int_to_ptr.vmem [resolvable:$true] %s19_s22 }
   0x5   :  { %p1149_p1 = scmp.lt.u32.totalorder %s1145_s25, %s1545_s0 }
   0x7   :  { %p1151_p2 = pnand %p1149_p1, %p1146_p0 }
   0x9   :  { %1154 = shalt.err (!%p1151_p2)
}
   0xa   :  { %s1155_s30 = scalar_lea.vmem %s20_s22, 1536  ;;  %s1159_s7 = scalar_lea.vmem %s20_s22, 8192 }
   0xb   :  { %p1156_p3 = scmp.ne.s32.totalorder %s20_s22, %s1155_s30  ;;  %p1160_p4 = scmp.lt.s32.totalorder %s20_s22, %s20_s22 }
   0xc   :  { %p1161_p5 = scmp.lt.s32.totalorder %s1159_s7, %s1155_s30 }
   0xe   :  { %p1162_p6 = por %p1161_p5, %p1160_p4 }
  0x10   :  { %p1163_p7 = pnand %p1162_p6, %p1156_p3 }
  0x12   :  { %1166 = shalt.err (!%p1163_p7)
}
  0x13   :  { %s1240_s8 = smov 512   ;;  %s1241_s9 = smov 32  }
  0x14   :  { %25 = dma.hbm_to_vmem [thread:$0]  %s1545_s0, 1536, %s20_s22, [#allocation3], %s1240_s8, %s1240_s8, %s1241_s9  }
  0x15   :  { %30 = vsyncadd [#allocation6], 1664  ;;  %s1242_s12 = smov [#allocation5]   ;;  %s1167_s16 = scalar_lea.hbm %s1546_s1, 384 }
  0x16   :  { %s31_s13 = sshll.u32 %s1242_s12, 4  ;;  %p1168_p8 = scmp.ne.s32.totalorder %s1546_s1, %s1167_s16  ;;  %s32_s13 = int_to_ptr.vmem [resolvable:$true] %s31_s13 }
  0x17   :  { %p1171_p9 = scmp.lt.u32.totalorder %s1167_s16, %s1546_s1 }
  0x19   :  { %p1173_p10 = pnand %p1171_p9, %p1168_p8 }
  0x1b   :  { %1176 = shalt.err (!%p1173_p10)
}
  0x1c   :  { %s1177_s21 = scalar_lea.vmem %s32_s13, 384  ;;  %s1181_s0 = scalar_lea.vmem %s32_s13, 2048 }
  0x1d   :  { %p1178_p11 = scmp.ne.s32.totalorder %s32_s13, %s1177_s21  ;;  %p1182_p12 = scmp.lt.s32.totalorder %s32_s13, %s32_s13 }
  0x1e   :  { %p1183_p13 = scmp.lt.s32.totalorder %s1181_s0, %s1177_s21 }
  0x20   :  { %p1184_p0 = por %p1183_p13, %p1182_p12 }
  0x22   :  { %p1185_p1 = pnand %p1184_p0, %p1178_p11 }
  0x24   :  { %1188 = shalt.err (!%p1185_p1)
}
  0x25   :  { %s1243_s22 = smov 128   ;;  %s1244_s23 = smov 8  }
  0x26   :  { %37 = dma.hbm_to_vmem [thread:$0]  %s1546_s1, 384, %s32_s13, [#allocation6], %s1243_s22, %s1243_s22, %s1244_s23  }
  0x27   :  { %s1245_s26 = smov [#allocation7]   ;;  %s1189_s30 = scalar_lea.hbm %s1547_s2, 4096 }
  0x28   :  { %s43_s27 = sshll.u32 %s1245_s26, 4  ;;  %p1190_p2 = scmp.ne.s32.totalorder %s1547_s2, %s1189_s30  ;;  %s44_s27 = int_to_ptr.vmem [resolvable:$true] %s43_s27 }
  0x29   :  { %p1193_p3 = scmp.lt.u32.totalorder %s1189_s30, %s1547_s2 }
  0x2b   :  { %p1195_p4 = pnand %p1193_p3, %p1190_p2 }
  0x2d   :  { %1198 = shalt.err (!%p1195_p4)
}
  0x2e   :  { %s1199_s11 = scalar_lea.vmem %s44_s27, 4096  ;;  %p1204_p6 = scmp.lt.s32.totalorder %s44_s27, %s44_s27 }
  0x2f   :  { %p1200_p5 = scmp.ne.s32.totalorder %s44_s27, %s1199_s11  ;;  %p1205_p7 = scmp.lt.s32.totalorder %s1199_s11, %s1199_s11 }
  0x31   :  { %p1206_p8 = por %p1205_p7, %p1204_p6 }
  0x33   :  { %p1207_p9 = pnand %p1206_p8, %p1200_p5 }
  0x35   :  { %1210 = shalt.err (!%p1207_p9)
}
  0x36   :  { %s1246_s1 = smov 64   ;;  %s1247_s12 = smov 4  }
  0x37   :  { %49 = dma.hbm_to_vmem [thread:$0]  %s1547_s2, 4096, %s44_s27, [#allocation6], %s1246_s1, %s1246_s1, %s1247_s12  }
  0x38   :  { %1233 = dma.done.wait [#allocation3], 8192  }
  0x39   :  { %1234 = vsyncadd [#allocation3], 4294959104 }
  0x3a   :  { %1235 = dma.done.wait [#allocation6], 6144  }
  0x3b   :  { %1236 = vsyncadd [#allocation6], 4294961152  ;;  %v1081_v0 = vld [vmem:[#allocation7 + $0x40] sm:$0xff]   ;;  %v1085_v4 = vld [vmem:[#allocation7 + $0x48] sm:$0xff]  }
  0x3c   :  { %v1082_v1 = vld [vmem:[#allocation7 + $0xc0] sm:$0xff]   ;;  %943 = vmatprep.subr.bf16.mxu0 %v1081_v0  ;;  %v1086_v5 = vld [vmem:[#allocation7 + $0xc8] sm:$0xff]   ;;  %v1089_v8 = vld [vmem:[#allocation7 + $0x50] sm:$0xff]  }
  0x3d   :  { %v1083_v2 = vld [vmem:[#allocation7] sm:$0xff]   ;;  %1007 = vmatprep.subr.bf16.mxu1 %v1082_v1  ;;  %v1087_v6 = vld [vmem:[#allocation7 + $0x8] sm:$0xff]   ;;  %v1090_v9 = vld [vmem:[#allocation7 + $0xd0] sm:$0xff]  }
  0x3e   :  { %v1084_v3 = vld [vmem:[#allocation7 + $0x80] sm:$0xff]   ;;  %944 = vmatpush3.bf16.msra.mxu0 %v1083_v2  ;;  %v1088_v7 = vld [vmem:[#allocation7 + $0x88] sm:$0xff]   ;;  %v1091_v10 = vld [vmem:[#allocation7 + $0x10] sm:$0xff]  }
  0x3f   :  { %1008 = vmatpush3.bf16.msra.mxu1 %v1084_v3  ;;  %945 = vmatprep.subr.bf16.mxu0 %v1085_v4  ;;  %v1092_v11 = vld [vmem:[#allocation7 + $0x90] sm:$0xff]   ;;  %v1093_v12 = vld [vmem:[#allocation7 + $0x58] sm:$0xff]   ;;  %v1097_v16 = vld [vmem:[#allocation7 + $0x60] sm:$0xff]  }
  0x40   :  { %1009 = vmatprep.subr.bf16.mxu1 %v1086_v5  ;;  %v1094_v13 = vld [vmem:[#allocation7 + $0xd8] sm:$0xff]   ;;  %v1098_v17 = vld [vmem:[#allocation7 + $0xe0] sm:$0xff]   ;;  %v1101_v20 = vld [vmem:[#allocation7 + $0x68] sm:$0xff]  }
  0x41   :  { %v1095_v14 = vld [vmem:[#allocation7 + $0x18] sm:$0xff]   ;;  %v1099_v18 = vld [vmem:[#allocation7 + $0x20] sm:$0xff]   ;;  %v1102_v21 = vld [vmem:[#allocation7 + $0xe8] sm:$0xff]  }
  0x42   :  { %946 = vmatpush3.bf16.msra.mxu0 %v1087_v6  ;;  %v1096_v15 = vld [vmem:[#allocation7 + $0x98] sm:$0xff]   ;;  %v1100_v19 = vld [vmem:[#allocation7 + $0xa0] sm:$0xff]   ;;  %v1103_v22 = vld [vmem:[#allocation7 + $0x28] sm:$0xff]  }
  0x43   :  { %1010 = vmatpush3.bf16.msra.mxu1 %v1088_v7  ;;  %947 = vmatprep.subr.bf16.mxu0 %v1089_v8  ;;  %v1104_v23 = vld [vmem:[#allocation7 + $0xa8] sm:$0xff]   ;;  %v1105_v24 = vld [vmem:[#allocation7 + $0x70] sm:$0xff]   ;;  %v1109_v28 = vld [vmem:[#allocation7 + $0x78] sm:$0xff]  }
  0x44   :  { %1011 = vmatprep.subr.bf16.mxu1 %v1090_v9  ;;  %v1106_v25 = vld [vmem:[#allocation7 + $0xf0] sm:$0xff]   ;;  %v1110_v29 = vld [vmem:[#allocation7 + $0xf8] sm:$0xff]   ;;  %v67_v32 = vld [vmem:[#allocation2 + $0x8] sm:$0xff] }
  0x45   :  { %v1107_v26 = vld [vmem:[#allocation7 + $0x30] sm:$0xff]   ;;  %v1111_v30 = vld [vmem:[#allocation7 + $0x38] sm:$0xff]   ;;  %v71_v33 = vld [vmem:[#allocation2 + $0x28] sm:$0xff] }
  0x46   :  { %948 = vmatpush3.bf16.msra.mxu0 %v1091_v10  ;;  %v1108_v27 = vld [vmem:[#allocation7 + $0xb0] sm:$0xff]   ;;  %v1112_v31 = vld [vmem:[#allocation7 + $0xb8] sm:$0xff]   ;;  %v131_v35 = vpack.c.bf16 %v71_v33, %v67_v32  ;;  %v66_v37 = vld [vmem:[#allocation2] sm:$0xff] }
  0x47   :  { %1012 = vmatpush3.bf16.msra.mxu1 %v1092_v11  ;;  %949 = vmatprep.subr.bf16.mxu0 %v1093_v12  ;;  %v69_v34 = vld [vmem:[#allocation2 + $0x18] sm:$0xff]  ;;  %v70_v38 = vld [vmem:[#allocation2 + $0x20] sm:$0xff]  ;;  %v68_v41 = vld [vmem:[#allocation2 + $0x10] sm:$0xff] }
  0x48   :  { %1013 = vmatprep.subr.bf16.mxu1 %v1094_v13  ;;  %v73_v36 = vld [vmem:[#allocation2 + $0x38] sm:$0xff]  ;;  %v130_v40 = vpack.c.bf16 %v70_v38, %v66_v37  ;;  %v72_v42 = vld [vmem:[#allocation2 + $0x30] sm:$0xff]  ;;  %v75_v43 = vld [vmem:[#allocation2 + $0x48] sm:$0xff]  ;;  %457 = vmatprep.mubr.bf16.mxu0 %v131_v35 }
  0x49   :  { %v133_v39 = vpack.c.bf16 %v73_v36, %v69_v34  ;;  %v132_v44 = vpack.c.bf16 %v72_v42, %v68_v41  ;;  %v79_v45 = vld [vmem:[#allocation2 + $0x68] sm:$0xff]  ;;  %v77_v46 = vld [vmem:[#allocation2 + $0x58] sm:$0xff]  ;;  %v74_v50 = vld [vmem:[#allocation2 + $0x40] sm:$0xff] }
  0x4a   :  { %950 = vmatpush3.bf16.msra.mxu0 %v1095_v14  ;;  %v81_v47 = vld [vmem:[#allocation2 + $0x78] sm:$0xff]  ;;  %v135_v48 = vpack.c.bf16 %v79_v45, %v75_v43  ;;  %v78_v51 = vld [vmem:[#allocation2 + $0x60] sm:$0xff]  ;;  %v76_v52 = vld [vmem:[#allocation2 + $0x50] sm:$0xff] }
  0x4b   :  { %1014 = vmatpush3.bf16.msra.mxu1 %v1096_v15  ;;  %951 = vmatprep.subr.bf16.mxu0 %v1097_v16  ;;  %v137_v49 = vpack.c.bf16 %v81_v47, %v77_v46  ;;  %v80_v53 = vld [vmem:[#allocation2 + $0x70] sm:$0xff]  ;;  %v83_v54 = vld [vmem:[#allocation2 + $0x88] sm:$0xff]  ;;  %v85_v56 = vld [vmem:[#allocation2 + $0x98] sm:$0xff]  ;;  %v134_v58 = vpack.c.bf16 %v78_v51, %v74_v50 }
  0x4c   :  { %1015 = vmatprep.subr.bf16.mxu1 %v1098_v17  ;;  %554 = vmatprep.mubr.bf16.mxu1 %v133_v39  ;;  %v87_v55 = vld [vmem:[#allocation2 + $0xa8] sm:$0xff]  ;;  %v89_v57 = vld [vmem:[#allocation2 + $0xb8] sm:$0xff]  ;;  %v136_v59 = vpack.c.bf16 %v80_v53, %v76_v52  ;;  %v82_v62 = vld [vmem:[#allocation2 + $0x80] sm:$0xff] }
  0x4d   :  { %v139_v60 = vpack.c.bf16 %v87_v55, %v83_v54  ;;  %v141_v61 = vpack.c.bf16 %v89_v57, %v85_v56  ;;  %v86_v63 = vld [vmem:[#allocation2 + $0xa0] sm:$0xff]  ;;  %v84_v0 = vld [vmem:[#allocation2 + $0x90] sm:$0xff]  ;;  %v91_v2 = vld [vmem:[#allocation2 + $0xc8] sm:$0xff] }
  0x4e   :  { %952 = vmatpush3.bf16.msra.mxu0 %v1099_v18  ;;  %v88_v1 = vld [vmem:[#allocation2 + $0xb0] sm:$0xff]  ;;  %v95_v3 = vld [vmem:[#allocation2 + $0xe8] sm:$0xff]  ;;  %v93_v4 = vld [vmem:[#allocation2 + $0xd8] sm:$0xff]  ;;  %v138_v6 = vpack.c.bf16 %v86_v63, %v82_v62 }
  0x4f   :  { %1016 = vmatpush3.bf16.msra.mxu1 %v1100_v19  ;;  %953 = vmatprep.subr.bf16.mxu0 %v1101_v20  ;;  %v97_v5 = vld [vmem:[#allocation2 + $0xf8] sm:$0xff]  ;;  %v140_v7 = vpack.c.bf16 %v88_v1, %v84_v0  ;;  %v143_v8 = vpack.c.bf16 %v95_v3, %v91_v2  ;;  %v90_v10 = vld [vmem:[#allocation2 + $0xc0] sm:$0xff]  ;;  %v92_v12 = vld [vmem:[#allocation2 + $0xd0] sm:$0xff] }
  0x50   :  { %1017 = vmatprep.subr.bf16.mxu1 %v1102_v21  ;;  %v145_v9 = vpack.c.bf16 %v97_v5, %v93_v4  ;;  %v94_v11 = vld [vmem:[#allocation2 + $0xe0] sm:$0xff]  ;;  %v96_v13 = vld [vmem:[#allocation2 + $0xf0] sm:$0xff]  ;;  %v99_v14 = vld [vmem:[#allocation2 + $0x108] sm:$0xff] }
  0x51   :  { %v103_v15 = vld [vmem:[#allocation2 + $0x128] sm:$0xff]  ;;  %v101_v16 = vld [vmem:[#allocation2 + $0x118] sm:$0xff]  ;;  %v142_v18 = vpack.c.bf16 %v94_v11, %v90_v10  ;;  %v144_v19 = vpack.c.bf16 %v96_v13, %v92_v12  ;;  %v106_v34 = vld [vmem:[#allocation2 + $0x140] sm:$0xff] }
  0x52   :  { %954 = vmatpush3.bf16.msra.mxu0 %v1103_v22  ;;  %v105_v17 = vld [vmem:[#allocation2 + $0x138] sm:$0xff]  ;;  %v147_v20 = vpack.c.bf16 %v103_v15, %v99_v14  ;;  %v98_v22 = vld [vmem:[#allocation2 + $0x100] sm:$0xff]  ;;  %v108_v36 = vld [vmem:[#allocation2 + $0x150] sm:$0xff] }
  0x53   :  { %1018 = vmatpush3.bf16.msra.mxu1 %v1104_v23  ;;  %955 = vmatprep.subr.bf16.mxu0 %v1105_v24  ;;  %v149_v21 = vpack.c.bf16 %v105_v17, %v101_v16  ;;  %v102_v23 = vld [vmem:[#allocation2 + $0x120] sm:$0xff]  ;;  %v100_v24 = vld [vmem:[#allocation2 + $0x110] sm:$0xff]  ;;  %v115_v38 = vld [vmem:[#allocation2 + $0x188] sm:$0xff] }
  0x54   :  { %1019 = vmatprep.subr.bf16.mxu1 %v1106_v25  ;;  %v104_v25 = vld [vmem:[#allocation2 + $0x130] sm:$0xff]  ;;  %v110_v35 = vld [vmem:[#allocation2 + $0x160] sm:$0xff]  ;;  %v119_v39 = vld [vmem:[#allocation2 + $0x1a8] sm:$0xff] }
  0x55   :  { %v112_v37 = vld [vmem:[#allocation2 + $0x170] sm:$0xff]  ;;  %v121_v41 = vld [vmem:[#allocation2 + $0x1b8] sm:$0xff]  ;;  %v150_v42 = vpack.c.bf16 %v110_v35, %v106_v34  ;;  %v114_v46 = vld [vmem:[#allocation2 + $0x180] sm:$0xff] }
  0x56   :  { %956 = vmatpush3.bf16.msra.mxu0 %v1107_v26  ;;  %v107_v26 = vld [vmem:[#allocation2 + $0x148] sm:$0xff]  ;;  %v152_v43 = vpack.c.bf16 %v112_v37, %v108_v36  ;;  %v118_v47 = vld [vmem:[#allocation2 + $0x1a0] sm:$0xff]  ;;  %v125_v52 = vld [vmem:[#allocation2 + $0x1d8] sm:$0xff] }
  0x57   :  { %1020 = vmatpush3.bf16.msra.mxu1 %v1108_v27  ;;  %957 = vmatprep.subr.bf16.mxu0 %v1109_v28  ;;  %v111_v27 = vld [vmem:[#allocation2 + $0x168] sm:$0xff]  ;;  %v109_v28 = vld [vmem:[#allocation2 + $0x158] sm:$0xff]  ;;  %v154_v54 = vpack.c.bf16 %v118_v47, %v114_v46  ;;  %v1326_v2 = vld [vmem:[%s1548_s3] ss:$0 sm:$0xff] }
  0x58   :  { %1021 = vmatprep.subr.bf16.mxu1 %v1110_v29  ;;  %v113_v29 = vld [vmem:[#allocation2 + $0x178] sm:$0xff]  ;;  %v151_v32 = vpack.c.bf16 %v111_v27, %v107_v26  ;;  %v123_v50 = vld [vmem:[#allocation2 + $0x1c8] sm:$0xff]  ;;  %v619_v14 = vld [vmem:[#allocation5] sm:$0xff] }
  0x59   :  { %v153_v33 = vpack.c.bf16 %v113_v29, %v109_v28  ;;  %v127_v51 = vld [vmem:[#allocation2 + $0x1e8] sm:$0xff]  ;;  %v129_v53 = vld [vmem:[#allocation2 + $0x1f8] sm:$0xff]  ;;  %v621_v34 = vld [vmem:[#allocation5 + $0x10] sm:$0xff] }
  0x5a   :  { %958 = vmatpush3.bf16.msra.mxu0 %v1111_v30  ;;  %v146_v30 = vpack.c.bf16 %v102_v23, %v98_v22  ;;  %v159_v56 = vpack.c.bf16 %v127_v51, %v123_v50  ;;  %v161_v57 = vpack.c.bf16 %v129_v53, %v125_v52  ;;  %v620_v22 = vld [vmem:[#allocation5 + $0x8] sm:$0xff] }
  0x5b   :  { %1022 = vmatpush3.bf16.msra.mxu1 %v1112_v31  ;;  %v148_v31 = vpack.c.bf16 %v104_v25, %v100_v24 }
  0x5d   :  { %458 = vmatmul.mubr.bf16.vlgmr.msra.gmra.mrb[0].mxu0 %v130_v40  ;;  %v117_v40 = vld [vmem:[#allocation2 + $0x198] sm:$0xff] }
  0x5e   :  { %555 = vmatmul.mubr.bf16.vlgmr.msra.gmra.mrb[0].mxu1 %v132_v44  ;;  %465 = vmatprep.mubr.bf16.mxu0 %v135_v48  ;;  %v155_v44 = vpack.c.bf16 %v119_v39, %v115_v38  ;;  %v157_v45 = vpack.c.bf16 %v121_v41, %v117_v40  ;;  %v116_v48 = vld [vmem:[#allocation2 + $0x190] sm:$0xff] }
  0x5f   :  { %562 = vmatprep.mubr.bf16.mxu1 %v137_v49  ;;  %v120_v49 = vld [vmem:[#allocation2 + $0x1b0] sm:$0xff] }
  0x60   :  { %v156_v55 = vpack.c.bf16 %v120_v49, %v116_v48 }
  0x65   :  { %466 = vmatmul.mubr.bf16.gmra.mrb[4].mxu0 %v134_v58  ;;  %v122_v58 = vld [vmem:[#allocation2 + $0x1c0] sm:$0xff] }
  0x66   :  { %563 = vmatmul.mubr.bf16.gmra.mrb[4].mxu1 %v136_v59  ;;  %473 = vmatprep.mubr.bf16.mxu0 %v139_v60  ;;  %v126_v59 = vld [vmem:[#allocation2 + $0x1e0] sm:$0xff]  ;;  %v124_v60 = vld [vmem:[#allocation2 + $0x1d0] sm:$0xff] }
  0x67   :  { %570 = vmatprep.mubr.bf16.mxu1 %v141_v61  ;;  %v128_v61 = vld [vmem:[#allocation2 + $0x1f0] sm:$0xff]  ;;  %v158_v62 = vpack.c.bf16 %v126_v59, %v122_v58 }
  0x68   :  { %v160_v63 = vpack.c.bf16 %v128_v61, %v124_v60 }
  0x6d   :  { %474 = vmatmul.mubr.bf16.gmra.mrb[8].mxu0 %v138_v6 }
  0x6e   :  { %571 = vmatmul.mubr.bf16.gmra.mrb[8].mxu1 %v140_v7  ;;  %481 = vmatprep.mubr.bf16.mxu0 %v143_v8 }
  0x6f   :  { %578 = vmatprep.mubr.bf16.mxu1 %v145_v9 }
  0x75   :  { %482 = vmatmul.mubr.bf16.gmra.mrb[12].mxu0 %v142_v18 }
  0x76   :  { %579 = vmatmul.mubr.bf16.gmra.mrb[12].mxu1 %v144_v19  ;;  %489 = vmatprep.mubr.bf16.mxu0 %v147_v20 }
  0x77   :  { %586 = vmatprep.mubr.bf16.mxu1 %v149_v21 }
  0x7d   :  { %490 = vmatmul.mubr.bf16.gmra.mrb[16].mxu0 %v146_v30 }
  0x7e   :  { %587 = vmatmul.mubr.bf16.gmra.mrb[16].mxu1 %v148_v31  ;;  %497 = vmatprep.mubr.bf16.mxu0 %v151_v32 }
  0x7f   :  { %594 = vmatprep.mubr.bf16.mxu1 %v153_v33 }
  0x85   :  { %498 = vmatmul.mubr.bf16.gmra.mrb[20].mxu0 %v150_v42  ;;  %v622_v42 = vld [vmem:[#allocation5 + $0x18] sm:$0xff] }
  0x86   :  { %595 = vmatmul.mubr.bf16.gmra.mrb[20].mxu1 %v152_v43  ;;  %505 = vmatprep.mubr.bf16.mxu0 %v155_v44 }
  0x87   :  { %602 = vmatprep.mubr.bf16.mxu1 %v157_v45 }
  0x8d   :  { %506 = vmatmul.mubr.bf16.gmra.mrb[24].mxu0 %v154_v54  ;;  %v623_v54 = vld [vmem:[#allocation5 + $0x20] sm:$0xff] }
  0x8e   :  { %603 = vmatmul.mubr.bf16.gmra.mrb[24].mxu1 %v156_v55  ;;  %513 = vmatprep.mubr.bf16.mxu0 %v159_v56 }
  0x8f   :  { %610 = vmatprep.mubr.bf16.mxu1 %v161_v57  ;;  %v624_v57 = vld [vmem:[#allocation5 + $0x28] sm:$0xff] }
  0x95   :  { %514 = vmatmul.mubr.bf16.gmra.mrb[28].mxu0 %v158_v62 }
  0x96   :  { %611 = vmatmul.mubr.bf16.gmra.mrb[28].mxu1 %v160_v63 }
 0x130   :  { %v959_v0 = vpop.f32.mrb[0].mxu0 }
 0x131   :  { %v1023_v1 = vpop.f32.mrb[0].mxu1  ;;  %v960_v3 = vpop.f32.mrb[1].mxu0 }
 0x132   :  { %v961_v4 = vadd.f32 %v960_v3, %v959_v0  ;;  %v1024_v5 = vpop.f32.mrb[1].mxu1  ;;  %v962_v6 = vpop.f32.mrb[2].mxu0 }
 0x133   :  { %v1025_v7 = vadd.f32 %v1024_v5, %v1023_v1  ;;  %v1026_v8 = vpop.f32.mrb[2].mxu1  ;;  %v963_v9 = vpop.f32.mrb[3].mxu0 }
 0x134   :  { %v460_v10 = vadd.f32 %v961_v4, %v1326_v2  ;;  %v964_v11 = vadd.f32 %v963_v9, %v962_v6  ;;  %v1027_v12 = vpop.f32.mrb[3].mxu1 }
 0x135   :  { %v1028_v13 = vadd.f32 %v1027_v12, %v1026_v8 }
 0x136   :  { %v557_v15 = vadd.f32 %v1025_v7, %v460_v10  ;;  %v463_v16 = vadd.f32 %v964_v11, %v1326_v2  ;;  %v625_v11 = vld [vmem:[#allocation5 + $0x30] sm:$0xff] }
 0x138   :  { %v560_v17 = vadd.f32 %v1028_v13, %v463_v16  ;;  %v965_v18 = vpop.f32.mrb[4].mxu0  ;;  %v1330_v19 = vadd.f32 %v619_v14, %v557_v15  ;;  %v626_v14 = vld [vmem:[#allocation5 + $0x38] sm:$0xff] }
 0x139   :  { %v1029_v20 = vpop.f32.mrb[4].mxu1  ;;  %v966_v21 = vpop.f32.mrb[5].mxu0 }
 0x13a   :  { %v967_v23 = vadd.f32 %v966_v21, %v965_v18  ;;  %v1030_v24 = vpop.f32.mrb[5].mxu1  ;;  %v968_v25 = vpop.f32.mrb[6].mxu0  ;;  %651 = vadd.xlane.f32.xlu0 %v1330_v19  ;;  %v1334_v32 = vadd.f32 %v620_v22, %v560_v17 }
 0x13b   :  { %v1031_v26 = vadd.f32 %v1030_v24, %v1029_v20  ;;  %v1032_v27 = vpop.f32.mrb[6].mxu1  ;;  %v969_v28 = vpop.f32.mrb[7].mxu0 }
 0x13c   :  { %v468_v29 = vadd.f32 %v967_v23, %v1326_v2  ;;  %v970_v30 = vadd.f32 %v969_v28, %v968_v25  ;;  %v1033_v31 = vpop.f32.mrb[7].mxu1 }
 0x13d   :  { %v1034_v33 = vadd.f32 %v1033_v31, %v1032_v27 }
 0x13e   :  { %v565_v35 = vadd.f32 %v1031_v26, %v468_v29  ;;  %v471_v36 = vadd.f32 %v970_v30, %v1326_v2  ;;  %653 = vadd.xlane.f32.xlu0 %v1334_v32 }
 0x140   :  { %v568_v37 = vadd.f32 %v1034_v33, %v471_v36  ;;  %v971_v38 = vpop.f32.mrb[8].mxu0  ;;  %v1338_v39 = vadd.f32 %v621_v34, %v565_v35  ;;  %v627_v33 = vld [vmem:[#allocation5 + $0x40] sm:$0xff]  ;;  %v628_v36 = vld [vmem:[#allocation5 + $0x48] sm:$0xff] }
 0x141   :  { %v1035_v40 = vpop.f32.mrb[8].mxu1  ;;  %v972_v41 = vpop.f32.mrb[9].mxu0 }
 0x142   :  { %v973_v43 = vadd.f32 %v972_v41, %v971_v38  ;;  %v1036_v44 = vpop.f32.mrb[9].mxu1  ;;  %v974_v45 = vpop.f32.mrb[10].mxu0  ;;  %655 = vadd.xlane.f32.xlu1 %v1338_v39  ;;  %v1342_v52 = vadd.f32 %v622_v42, %v568_v37 }
 0x143   :  { %v1037_v46 = vadd.f32 %v1036_v44, %v1035_v40  ;;  %v1038_v47 = vpop.f32.mrb[10].mxu1  ;;  %v975_v48 = vpop.f32.mrb[11].mxu0 }
 0x144   :  { %v476_v49 = vadd.f32 %v973_v43, %v1326_v2  ;;  %v976_v50 = vadd.f32 %v975_v48, %v974_v45  ;;  %v1039_v51 = vpop.f32.mrb[11].mxu1 }
 0x145   :  { %v1040_v53 = vadd.f32 %v1039_v51, %v1038_v47 }
 0x146   :  { %v573_v55 = vadd.f32 %v1037_v46, %v476_v49  ;;  %v479_v56 = vadd.f32 %v976_v50, %v1326_v2  ;;  %657 = vadd.xlane.f32.xlu1 %v1342_v52 }
 0x148   :  { %v576_v58 = vadd.f32 %v1040_v53, %v479_v56  ;;  %v977_v59 = vpop.f32.mrb[12].mxu0  ;;  %v1346_v60 = vadd.f32 %v623_v54, %v573_v55  ;;  %v629_v55 = vld [vmem:[#allocation5 + $0x50] sm:$0xff] }
 0x149   :  { %v1041_v61 = vpop.f32.mrb[12].mxu1  ;;  %v978_v62 = vpop.f32.mrb[13].mxu0 }
 0x14a   :  { %v979_v63 = vadd.f32 %v978_v62, %v977_v59  ;;  %v1042_v0 = vpop.f32.mrb[13].mxu1  ;;  %v980_v1 = vpop.f32.mrb[14].mxu0  ;;  %659 = vadd.xlane.f32.xlu0 %v1346_v60  ;;  %v1349_v3 = vadd.f32 %v624_v57, %v576_v58  ;;  %v630_v58 = vld [vmem:[#allocation5 + $0x58] sm:$0xff] }
 0x14b   :  { %v1043_v4 = vadd.f32 %v1042_v0, %v1041_v61  ;;  %v1044_v5 = vpop.f32.mrb[14].mxu1  ;;  %v981_v6 = vpop.f32.mrb[15].mxu0 }
 0x14c   :  { %v484_v7 = vadd.f32 %v979_v63, %v1326_v2  ;;  %v982_v8 = vadd.f32 %v981_v6, %v980_v1  ;;  %v1045_v9 = vpop.f32.mrb[15].mxu1  ;;  %661 = vadd.xlane.f32.xlu1 %v1349_v3 }
 0x14d   :  { %v1046_v10 = vadd.f32 %v1045_v9, %v1044_v5 }
 0x14e   :  { %v581_v12 = vadd.f32 %v1043_v4, %v484_v7  ;;  %v487_v13 = vadd.f32 %v982_v8, %v1326_v2 }
 0x150   :  { %v584_v15 = vadd.f32 %v1046_v10, %v487_v13  ;;  %v983_v16 = vpop.f32.mrb[16].mxu0  ;;  %v1354_v17 = vadd.f32 %v625_v11, %v581_v12 }
 0x151   :  { %v1047_v18 = vpop.f32.mrb[16].mxu1  ;;  %v984_v20 = vpop.f32.mrb[17].mxu0 }
 0x152   :  { %v985_v21 = vadd.f32 %v984_v20, %v983_v16  ;;  %v1048_v22 = vpop.f32.mrb[17].mxu1  ;;  %v986_v23 = vpop.f32.mrb[18].mxu0  ;;  %663 = vadd.xlane.f32.xlu0 %v1354_v17  ;;  %v1357_v24 = vadd.f32 %v626_v14, %v584_v15  ;;  %v631_v14 = vld [vmem:[#allocation5 + $0x60] sm:$0xff] }
 0x153   :  { %v1049_v25 = vadd.f32 %v1048_v22, %v1047_v18  ;;  %v1050_v26 = vpop.f32.mrb[18].mxu1  ;;  %v987_v27 = vpop.f32.mrb[19].mxu0  ;;  %v632_v18 = vld [vmem:[#allocation5 + $0x68] sm:$0xff] }
 0x154   :  { %v492_v28 = vadd.f32 %v985_v21, %v1326_v2  ;;  %v988_v29 = vadd.f32 %v987_v27, %v986_v23  ;;  %v1051_v30 = vpop.f32.mrb[19].mxu1  ;;  %665 = vadd.xlane.f32.xlu1 %v1357_v24 }
 0x155   :  { %v1052_v31 = vadd.f32 %v1051_v30, %v1050_v26 }
 0x156   :  { %v589_v34 = vadd.f32 %v1049_v25, %v492_v28  ;;  %v495_v35 = vadd.f32 %v988_v29, %v1326_v2 }
 0x158   :  { %v592_v37 = vadd.f32 %v1052_v31, %v495_v35  ;;  %v989_v38 = vpop.f32.mrb[20].mxu0  ;;  %v1362_v40 = vadd.f32 %v627_v33, %v589_v34 }
 0x159   :  { %v1053_v41 = vpop.f32.mrb[20].mxu1  ;;  %v990_v42 = vpop.f32.mrb[21].mxu0 }
 0x15a   :  { %v991_v43 = vadd.f32 %v990_v42, %v989_v38  ;;  %v1054_v44 = vpop.f32.mrb[21].mxu1  ;;  %v992_v45 = vpop.f32.mrb[22].mxu0  ;;  %667 = vadd.xlane.f32.xlu0 %v1362_v40  ;;  %v1365_v46 = vadd.f32 %v628_v36, %v592_v37  ;;  %v633_v38 = vld [vmem:[#allocation5 + $0x70] sm:$0xff] }
 0x15b   :  { %v1055_v47 = vadd.f32 %v1054_v44, %v1053_v41  ;;  %v1056_v48 = vpop.f32.mrb[22].mxu1  ;;  %v993_v49 = vpop.f32.mrb[23].mxu0 }
 0x15c   :  { %v500_v50 = vadd.f32 %v991_v43, %v1326_v2  ;;  %v994_v51 = vadd.f32 %v993_v49, %v992_v45  ;;  %v1057_v53 = vpop.f32.mrb[23].mxu1  ;;  %669 = vadd.xlane.f32.xlu1 %v1365_v46  ;;  %v634_v43 = vld [vmem:[#allocation5 + $0x78] sm:$0xff] }
 0x15d   :  { %v1058_v54 = vadd.f32 %v1057_v53, %v1056_v48 }
 0x15e   :  { %v597_v56 = vadd.f32 %v1055_v47, %v500_v50  ;;  %v503_v57 = vadd.f32 %v994_v51, %v1326_v2 }
 0x160   :  { %v600_v59 = vadd.f32 %v1058_v54, %v503_v57  ;;  %v995_v61 = vpop.f32.mrb[24].mxu0  ;;  %v1370_v62 = vadd.f32 %v629_v55, %v597_v56 }
 0x161   :  { %v1059_v63 = vpop.f32.mrb[24].mxu1  ;;  %v996_v0 = vpop.f32.mrb[25].mxu0 }
 0x162   :  { %v997_v1 = vadd.f32 %v996_v0, %v995_v61  ;;  %v1060_v4 = vpop.f32.mrb[25].mxu1  ;;  %v998_v5 = vpop.f32.mrb[26].mxu0  ;;  %671 = vadd.xlane.f32.xlu0 %v1370_v62  ;;  %v1373_v6 = vadd.f32 %v630_v58, %v600_v59 }
 0x163   :  { %v1061_v7 = vadd.f32 %v1060_v4, %v1059_v63  ;;  %v1062_v8 = vpop.f32.mrb[26].mxu1  ;;  %v999_v9 = vpop.f32.mrb[27].mxu0 }
 0x164   :  { %v508_v10 = vadd.f32 %v997_v1, %v1326_v2  ;;  %v1000_v11 = vadd.f32 %v999_v9, %v998_v5  ;;  %v1063_v12 = vpop.f32.mrb[27].mxu1  ;;  %673 = vadd.xlane.f32.xlu1 %v1373_v6 }
 0x165   :  { %v1064_v13 = vadd.f32 %v1063_v12, %v1062_v8 }
 0x166   :  { %v605_v15 = vadd.f32 %v1061_v7, %v508_v10  ;;  %v511_v16 = vadd.f32 %v1000_v11, %v1326_v2 }
 0x168   :  { %v608_v20 = vadd.f32 %v1064_v13, %v511_v16  ;;  %v1001_v21 = vpop.f32.mrb[28].mxu0  ;;  %v1378_v22 = vadd.f32 %v631_v14, %v605_v15 }
 0x169   :  { %v1065_v23 = vpop.f32.mrb[28].mxu1  ;;  %v1002_v25 = vpop.f32.mrb[29].mxu0 }
 0x16a   :  { %v1003_v26 = vadd.f32 %v1002_v25, %v1001_v21  ;;  %v1066_v27 = vpop.f32.mrb[29].mxu1  ;;  %v1004_v28 = vpop.f32.mrb[30].mxu0  ;;  %675 = vadd.xlane.f32.xlu0 %v1378_v22  ;;  %v1381_v29 = vadd.f32 %v632_v18, %v608_v20 }
 0x16b   :  { %v1067_v30 = vadd.f32 %v1066_v27, %v1065_v23  ;;  %v1068_v31 = vpop.f32.mrb[30].mxu1  ;;  %v1005_v33 = vpop.f32.mrb[31].mxu0 }
 0x16c   :  { %v516_v34 = vadd.f32 %v1003_v26, %v1326_v2  ;;  %v1006_v35 = vadd.f32 %v1005_v33, %v1004_v28  ;;  %v1069_v36 = vpop.f32.mrb[31].mxu1  ;;  %677 = vadd.xlane.f32.xlu1 %v1381_v29 }
 0x16d   :  { %v1070_v37 = vadd.f32 %v1069_v36, %v1068_v31 }
 0x16e   :  { %v613_v41 = vadd.f32 %v1067_v30, %v516_v34  ;;  %v519_v42 = vadd.f32 %v1006_v35, %v1326_v2 }
 0x170   :  { %v616_v44 = vadd.f32 %v1070_v37, %v519_v42  ;;  %v1386_v45 = vadd.f32 %v633_v38, %v613_v41 }
 0x172   :  { %679 = vadd.xlane.f32.xlu0 %v1386_v45  ;;  %v1389_v47 = vadd.f32 %v634_v43, %v616_v44 }
 0x174   :  { %681 = vadd.xlane.f32.xlu1 %v1389_v47 }
 0x1c7   :  { %v652_v48 = vpop.xlane.xlu0 %651 }
 0x1c8   :  { %v684_v49 = vmul.f32 0.0078125, %v652_v48 }
 0x1ca   :  { %v1393_v50 = vsub.f32 %v1330_v19, %v684_v49 }
 0x1cb   :  { %v654_v51 = vpop.xlane.xlu0 %653 }
 0x1cc   :  { %v685_v53 = vmul.f32 0.0078125, %v654_v51  ;;  %v716_v2 = vmul.f32 %v1393_v50, %v1393_v50 }
 0x1ce   :  { %v1398_v54 = vsub.f32 %v1334_v32, %v685_v53  ;;  %732 = vadd.xlane.f32.xlu0 %v716_v2 }
 0x1cf   :  { %v656_v55 = vpop.xlane.xlu1 %655 }
 0x1d0   :  { %v686_v56 = vmul.f32 0.0078125, %v656_v55  ;;  %v717_v57 = vmul.f32 %v1398_v54, %v1398_v54 }
 0x1d2   :  { %v1403_v58 = vsub.f32 %v1338_v39, %v686_v56  ;;  %734 = vadd.xlane.f32.xlu1 %v717_v57 }
 0x1d3   :  { %v658_v19 = vpop.xlane.xlu1 %657 }
 0x1d4   :  { %v687_v59 = vmul.f32 0.0078125, %v658_v19  ;;  %v718_v61 = vmul.f32 %v1403_v58, %v1403_v58 }
 0x1d6   :  { %v1408_v63 = vsub.f32 %v1342_v52, %v687_v59  ;;  %736 = vadd.xlane.f32.xlu0 %v718_v61  ;;  %v1475_v61 = vld [vmem:[%s1549_s4] ss:$0 sm:$0xff] }
 0x1d7   :  { %v660_v32 = vpop.xlane.xlu0 %659 }
 0x1d8   :  { %v688_v0 = vmul.f32 0.0078125, %v660_v32  ;;  %v719_v1 = vmul.f32 %v1408_v63, %v1408_v63 }
 0x1d9   :  { %v662_v4 = vpop.xlane.xlu1 %661 }
 0x1da   :  { %v1413_v5 = vsub.f32 %v1346_v60, %v688_v0  ;;  %v689_v39 = vmul.f32 0.0078125, %v662_v4  ;;  %738 = vadd.xlane.f32.xlu1 %v719_v1 }
 0x1dc   :  { %v1416_v7 = vsub.f32 %v1349_v3, %v689_v39  ;;  %v720_v8 = vmul.f32 %v1413_v5, %v1413_v5 }
 0x1de   :  { %740 = vadd.xlane.f32.xlu0 %v720_v8  ;;  %v721_v52 = vmul.f32 %v1416_v7, %v1416_v7  ;;  %v1481_v8 = vld [vmem:[%s1550_s5] ss:$0 sm:$0xff] }
 0x1df   :  { %v664_v9 = vpop.xlane.xlu0 %663 }
 0x1e0   :  { %v690_v10 = vmul.f32 0.0078125, %v664_v9  ;;  %742 = vadd.xlane.f32.xlu1 %v721_v52 }
 0x1e1   :  { %v666_v11 = vpop.xlane.xlu1 %665 }
 0x1e2   :  { %v1423_v12 = vsub.f32 %v1354_v17, %v690_v10  ;;  %v691_v60 = vmul.f32 0.0078125, %v666_v11 }
 0x1e4   :  { %v1426_v13 = vsub.f32 %v1357_v24, %v691_v60  ;;  %v722_v3 = vmul.f32 %v1423_v12, %v1423_v12 }
 0x1e6   :  { %744 = vadd.xlane.f32.xlu0 %v722_v3  ;;  %v723_v14 = vmul.f32 %v1426_v13, %v1426_v13 }
 0x1e7   :  { %v668_v15 = vpop.xlane.xlu0 %667 }
 0x1e8   :  { %v692_v16 = vmul.f32 0.0078125, %v668_v15  ;;  %746 = vadd.xlane.f32.xlu1 %v723_v14 }
 0x1e9   :  { %v670_v18 = vpop.xlane.xlu1 %669 }
 0x1ea   :  { %v1433_v20 = vsub.f32 %v1362_v40, %v692_v16  ;;  %v693_v17 = vmul.f32 0.0078125, %v670_v18 }
 0x1ec   :  { %v1436_v21 = vsub.f32 %v1365_v46, %v693_v17  ;;  %v724_v24 = vmul.f32 %v1433_v20, %v1433_v20 }
 0x1ee   :  { %748 = vadd.xlane.f32.xlu0 %v724_v24  ;;  %v725_v23 = vmul.f32 %v1436_v21, %v1436_v21 }
 0x1ef   :  { %v672_v25 = vpop.xlane.xlu0 %671 }
 0x1f0   :  { %v694_v26 = vmul.f32 0.0078125, %v672_v25  ;;  %750 = vadd.xlane.f32.xlu1 %v725_v23 }
 0x1f1   :  { %v674_v27 = vpop.xlane.xlu1 %673 }
 0x1f2   :  { %v1443_v28 = vsub.f32 %v1370_v62, %v694_v26  ;;  %v695_v40 = vmul.f32 0.0078125, %v674_v27 }
 0x1f4   :  { %v1446_v30 = vsub.f32 %v1373_v6, %v695_v40  ;;  %v726_v46 = vmul.f32 %v1443_v28, %v1443_v28 }
 0x1f6   :  { %752 = vadd.xlane.f32.xlu0 %v726_v46  ;;  %v727_v31 = vmul.f32 %v1446_v30, %v1446_v30 }
 0x1f7   :  { %v676_v33 = vpop.xlane.xlu0 %675 }
 0x1f8   :  { %v696_v34 = vmul.f32 0.0078125, %v676_v33  ;;  %754 = vadd.xlane.f32.xlu1 %v727_v31 }
 0x1f9   :  { %v678_v35 = vpop.xlane.xlu1 %677 }
 0x1fa   :  { %v1453_v36 = vsub.f32 %v1378_v22, %v696_v34  ;;  %v697_v62 = vmul.f32 0.0078125, %v678_v35 }
 0x1fc   :  { %v1456_v37 = vsub.f32 %v1381_v29, %v697_v62  ;;  %v728_v6 = vmul.f32 %v1453_v36, %v1453_v36 }
 0x1fe   :  { %756 = vadd.xlane.f32.xlu0 %v728_v6  ;;  %v729_v38 = vmul.f32 %v1456_v37, %v1456_v37 }
 0x1ff   :  { %v680_v41 = vpop.xlane.xlu0 %679 }
 0x200   :  { %v698_v42 = vmul.f32 0.0078125, %v680_v41  ;;  %758 = vadd.xlane.f32.xlu1 %v729_v38 }
 0x201   :  { %v682_v43 = vpop.xlane.xlu1 %681 }
 0x202   :  { %v1463_v44 = vsub.f32 %v1386_v45, %v698_v42  ;;  %v699_v22 = vmul.f32 0.0078125, %v682_v43 }
 0x204   :  { %v1466_v48 = vsub.f32 %v1389_v47, %v699_v22  ;;  %v730_v29 = vmul.f32 %v1463_v44, %v1463_v44 }
 0x206   :  { %760 = vadd.xlane.f32.xlu0 %v730_v29  ;;  %v731_v49 = vmul.f32 %v1466_v48, %v1466_v48 }
 0x208   :  { %762 = vadd.xlane.f32.xlu1 %v731_v49 }
 0x25b   :  { %v733_v51 = vpop.xlane.xlu0 %732 }
 0x25c   :  { %v764_v53 = vmul.f32 0.0078125, %v733_v51 }
 0x25e   :  { %v780_v2 = vadd.f32 1e-12, %v764_v53 }
 0x25f   :  { %v735_v55 = vpop.xlane.xlu1 %734 }
 0x260   :  { %1113 = vrsqrt.f32 %v780_v2  ;;  %v765_v56 = vmul.f32 0.0078125, %v735_v55 }
 0x262   :  { %v781_v45 = vadd.f32 1e-12, %v765_v56 }
 0x263   :  { %v737_v57 = vpop.xlane.xlu0 %736 }
 0x264   :  { %1115 = vrsqrt.f32 %v781_v45  ;;  %v766_v19 = vmul.f32 0.0078125, %v737_v57 }
 0x266   :  { %v782_v47 = vadd.f32 1e-12, %v766_v19 }
 0x267   :  { %v739_v59 = vpop.xlane.xlu1 %738 }
 0x268   :  { %1117 = vrsqrt.f32 %v782_v47  ;;  %v767_v32 = vmul.f32 0.0078125, %v739_v59 }
 0x26a   :  { %v1114_v0 = vpop.eup %1113  ;;  %v783_v1 = vadd.f32 1e-12, %v767_v32 }
 0x26b   :  { %v819_v4 = vmul.f32 %v1114_v0, %v1475_v61  ;;  %v741_v39 = vpop.xlane.xlu0 %740 }
 0x26c   :  { %1119 = vrsqrt.f32 %v783_v1  ;;  %v768_v52 = vmul.f32 0.0078125, %v741_v39 }
 0x26d   :  { %v835_v9 = vmul.f32 %v819_v4, %v1393_v50  ;;  %v743_v10 = vpop.xlane.xlu1 %742 }
 0x26e   :  { %v1116_v11 = vpop.eup %1115  ;;  %v784_v60 = vadd.f32 1e-12, %v768_v52  ;;  %v769_v3 = vmul.f32 0.0078125, %v743_v10 }
 0x26f   :  { %v858_v14 = vadd.f32 %v1481_v8, %v835_v9  ;;  %v820_v15 = vmul.f32 %v1116_v11, %v1475_v61 }
 0x270   :  { %1121 = vrsqrt.f32 %v784_v60  ;;  %v785_v16 = vadd.f32 1e-12, %v769_v3 }
 0x271   :  { %874 = vst [vmem:[#allocation8] sm:$0xff] %v858_v14  ;;  %v836_v18 = vmul.f32 %v820_v15, %v1398_v54 }
 0x272   :  { %v1118_v17 = vpop.eup %1117  ;;  %1123 = vrsqrt.f32 %v785_v16 }
 0x273   :  { %v859_v24 = vadd.f32 %v1481_v8, %v836_v18  ;;  %v821_v23 = vmul.f32 %v1118_v17, %v1475_v61  ;;  %v745_v50 = vpop.xlane.xlu0 %744 }
 0x274   :  { %v770_v25 = vmul.f32 0.0078125, %v745_v50 }
 0x275   :  { %875 = vst [vmem:[#allocation8 + $0x8] sm:$0xff] %v859_v24  ;;  %v837_v26 = vmul.f32 %v821_v23, %v1403_v58  ;;  %v747_v27 = vpop.xlane.xlu1 %746 }
 0x276   :  { %v1120_v40 = vpop.eup %1119  ;;  %v786_v46 = vadd.f32 1e-12, %v770_v25  ;;  %v771_v31 = vmul.f32 0.0078125, %v747_v27 }
 0x277   :  { %v860_v33 = vadd.f32 %v1481_v8, %v837_v26  ;;  %v822_v34 = vmul.f32 %v1120_v40, %v1475_v61 }
 0x278   :  { %1125 = vrsqrt.f32 %v786_v46  ;;  %v787_v54 = vadd.f32 1e-12, %v771_v31 }
 0x279   :  { %876 = vst [vmem:[#allocation8 + $0x10] sm:$0xff] %v860_v33  ;;  %v838_v35 = vmul.f32 %v822_v34, %v1408_v63 }
 0x27a   :  { %v1122_v62 = vpop.eup %1121  ;;  %1127 = vrsqrt.f32 %v787_v54 }
 0x27b   :  { %v861_v6 = vadd.f32 %v1481_v8, %v838_v35  ;;  %v823_v38 = vmul.f32 %v1122_v62, %v1475_v61  ;;  %v749_v58 = vpop.xlane.xlu0 %748 }
 0x27c   :  { %v1124_v41 = vpop.eup %1123  ;;  %v772_v42 = vmul.f32 0.0078125, %v749_v58 }
 0x27d   :  { %877 = vst [vmem:[#allocation8 + $0x18] sm:$0xff] %v861_v6  ;;  %v839_v43 = vmul.f32 %v823_v38, %v1413_v5  ;;  %v824_v22 = vmul.f32 %v1124_v41, %v1475_v61  ;;  %v751_v29 = vpop.xlane.xlu1 %750 }
 0x27e   :  { %v788_v49 = vadd.f32 1e-12, %v772_v42  ;;  %v773_v51 = vmul.f32 0.0078125, %v751_v29 }
 0x27f   :  { %v862_v53 = vadd.f32 %v1481_v8, %v839_v43  ;;  %v840_v63 = vmul.f32 %v824_v22, %v1416_v7 }
 0x280   :  { %1129 = vrsqrt.f32 %v788_v49  ;;  %v789_v2 = vadd.f32 1e-12, %v773_v51 }
 0x281   :  { %878 = vst [vmem:[#allocation8 + $0x20] sm:$0xff] %v862_v53  ;;  %v863_v55 = vadd.f32 %v1481_v8, %v840_v63 }
 0x282   :  { %v1126_v56 = vpop.eup %1125  ;;  %1131 = vrsqrt.f32 %v789_v2 }
 0x283   :  { %879 = vst [vmem:[#allocation8 + $0x28] sm:$0xff] %v863_v55  ;;  %v825_v45 = vmul.f32 %v1126_v56, %v1475_v61  ;;  %v753_v5 = vpop.xlane.xlu0 %752 }
 0x284   :  { %v1128_v57 = vpop.eup %1127  ;;  %v774_v19 = vmul.f32 0.0078125, %v753_v5 }
 0x285   :  { %v841_v47 = vmul.f32 %v825_v45, %v1423_v12  ;;  %v826_v59 = vmul.f32 %v1128_v57, %v1475_v61  ;;  %v755_v32 = vpop.xlane.xlu1 %754 }
 0x286   :  { %v790_v0 = vadd.f32 1e-12, %v774_v19  ;;  %v775_v7 = vmul.f32 0.0078125, %v755_v32 }
 0x287   :  { %v864_v1 = vadd.f32 %v1481_v8, %v841_v47  ;;  %v842_v4 = vmul.f32 %v826_v59, %v1426_v13 }
 0x288   :  { %1133 = vrsqrt.f32 %v790_v0  ;;  %v791_v39 = vadd.f32 1e-12, %v775_v7 }
 0x289   :  { %880 = vst [vmem:[#allocation8 + $0x30] sm:$0xff] %v864_v1  ;;  %v865_v52 = vadd.f32 %v1481_v8, %v842_v4 }
 0x28a   :  { %v1130_v9 = vpop.eup %1129  ;;  %1135 = vrsqrt.f32 %v791_v39 }
 0x28b   :  { %881 = vst [vmem:[#allocation8 + $0x38] sm:$0xff] %v865_v52  ;;  %v827_v10 = vmul.f32 %v1130_v9, %v1475_v61  ;;  %v757_v12 = vpop.xlane.xlu0 %756 }
 0x28c   :  { %v1132_v11 = vpop.eup %1131  ;;  %v776_v60 = vmul.f32 0.0078125, %v757_v12 }
 0x28d   :  { %v843_v3 = vmul.f32 %v827_v10, %v1433_v20  ;;  %v828_v14 = vmul.f32 %v1132_v11, %v1475_v61  ;;  %v759_v15 = vpop.xlane.xlu1 %758 }
 0x28e   :  { %v792_v16 = vadd.f32 1e-12, %v776_v60  ;;  %v777_v13 = vmul.f32 0.0078125, %v759_v15 }
 0x28f   :  { %v866_v18 = vadd.f32 %v1481_v8, %v843_v3  ;;  %v844_v17 = vmul.f32 %v828_v14, %v1436_v21 }
 0x290   :  { %1137 = vrsqrt.f32 %v792_v16  ;;  %v793_v24 = vadd.f32 1e-12, %v777_v13 }
 0x291   :  { %882 = vst [vmem:[#allocation8 + $0x40] sm:$0xff] %v866_v18  ;;  %v867_v23 = vadd.f32 %v1481_v8, %v844_v17 }
 0x292   :  { %v1134_v50 = vpop.eup %1133  ;;  %1139 = vrsqrt.f32 %v793_v24 }
 0x293   :  { %883 = vst [vmem:[#allocation8 + $0x48] sm:$0xff] %v867_v23  ;;  %v829_v25 = vmul.f32 %v1134_v50, %v1475_v61  ;;  %v761_v20 = vpop.xlane.xlu0 %760 }
 0x294   :  { %v1136_v26 = vpop.eup %1135  ;;  %v778_v27 = vmul.f32 0.0078125, %v761_v20 }
 0x295   :  { %v845_v40 = vmul.f32 %v829_v25, %v1443_v28  ;;  %v830_v46 = vmul.f32 %v1136_v26, %v1475_v61  ;;  %v763_v31 = vpop.xlane.xlu1 %762 }
 0x296   :  { %v794_v33 = vadd.f32 1e-12, %v778_v27  ;;  %v779_v21 = vmul.f32 0.0078125, %v763_v31 }
 0x297   :  { %v868_v34 = vadd.f32 %v1481_v8, %v845_v40  ;;  %v846_v54 = vmul.f32 %v830_v46, %v1446_v30 }
 0x298   :  { %1141 = vrsqrt.f32 %v794_v33  ;;  %v795_v35 = vadd.f32 1e-12, %v779_v21 }
 0x299   :  { %884 = vst [vmem:[#allocation8 + $0x50] sm:$0xff] %v868_v34  ;;  %v869_v62 = vadd.f32 %v1481_v8, %v846_v54 }
 0x29a   :  { %v1138_v6 = vpop.eup %1137  ;;  %1143 = vrsqrt.f32 %v795_v35 }
 0x29b   :  { %885 = vst [vmem:[#allocation8 + $0x58] sm:$0xff] %v869_v62  ;;  %v831_v38 = vmul.f32 %v1138_v6, %v1475_v61 }
 0x29c   :  { %v1140_v28 = vpop.eup %1139 }
 0x29d   :  { %v847_v58 = vmul.f32 %v831_v38, %v1453_v36  ;;  %v832_v41 = vmul.f32 %v1140_v28, %v1475_v61 }
 0x29f   :  { %v870_v42 = vadd.f32 %v1481_v8, %v847_v58  ;;  %v848_v43 = vmul.f32 %v832_v41, %v1456_v37 }
 0x2a1   :  { %886 = vst [vmem:[#allocation8 + $0x60] sm:$0xff] %v870_v42  ;;  %v871_v30 = vadd.f32 %v1481_v8, %v848_v43 }
 0x2a2   :  { %v1142_v22 = vpop.eup %1141 }
 0x2a3   :  { %887 = vst [vmem:[#allocation8 + $0x68] sm:$0xff] %v871_v30  ;;  %v833_v29 = vmul.f32 %v1142_v22, %v1475_v61 }
 0x2a4   :  { %v1144_v49 = vpop.eup %1143 }
 0x2a5   :  { %v849_v51 = vmul.f32 %v833_v29, %v1463_v44  ;;  %v834_v53 = vmul.f32 %v1144_v49, %v1475_v61 }
 0x2a7   :  { %v872_v36 = vadd.f32 %v1481_v8, %v849_v51  ;;  %v850_v63 = vmul.f32 %v834_v53, %v1466_v48 }
 0x2a9   :  { %888 = vst [vmem:[#allocation8 + $0x70] sm:$0xff] %v872_v36  ;;  %v873_v2 = vadd.f32 %v1481_v8, %v850_v63 }
 0x2ab   :  { %889 = vst [vmem:[#allocation8 + $0x78] sm:$0xff] %v873_v2 }
 0x2ac   :  { %894 = vsyncadd [#allocation4], 1664  ;;  %s1248_s4 = smov [#allocation8]  }
 0x2ad   :  { %s895_s5 = sshll.u32 %s1248_s4, 4  ;;  %s896_s5 = int_to_ptr.vmem [resolvable:$true] %s895_s5 }
 0x2ae   :  { %s1211_s19 = scalar_lea.vmem %s896_s5, 384  ;;  %s1215_s20 = scalar_lea.vmem %s896_s5, 2048 }
 0x2af   :  { %p1212_p10 = scmp.ne.s32.totalorder %s896_s5, %s1211_s19  ;;  %p1216_p11 = scmp.lt.s32.totalorder %s896_s5, %s896_s5 }
 0x2b0   :  { %p1217_p12 = scmp.lt.s32.totalorder %s1215_s20, %s1211_s19 }
 0x2b2   :  { %p1218_p13 = por %p1217_p12, %p1216_p11 }
 0x2b4   :  { %p1219_p0 = pnand %p1218_p13, %p1212_p10 }
 0x2b6   :  { %1222 = shalt.err (!%p1219_p0)
}
 0x2b7   :  { %s1223_s24 = scalar_lea.hbm %s1551_s6, 384 }
 0x2b8   :  { %p1224_p1 = scmp.ne.s32.totalorder %s1551_s6, %s1223_s24  ;;  %p1227_p2 = scmp.lt.u32.totalorder %s1223_s24, %s1551_s6 }
 0x2ba   :  { %p1229_p3 = pnand %p1227_p2, %p1224_p1 }
 0x2bc   :  { %1232 = shalt.err (!%p1229_p3)
}
 0x2bd   :  { %901 = dma.vmem_to_hbm [thread:$0]  %s896_s5, 384, %s1551_s6, [#allocation4], %s1243_s22, %s1243_s22, %s1244_s23  }
 0x2be   :  { %1237 = dma.done.wait [#allocation4], 2048  }
 0x2bf   :  { %1238 = vsyncadd [#allocation4], 4294965248 }
 0x2c0   :  { %905 = vsyncpa [#allocation3], 1 }
 0x2c1   :  { %906 = vsyncpa [#allocation6], 1 }
 0x2c2   :  { %907 = vsyncpa [#allocation4], 1 }

</bundles_post_ra>
